<compile_context>
chip_gen: v6e
topology: v6e:2x2x1
jax: 0.10.0
libtpu: 0.0.40
codegen_flags: <defaults>
</compile_context>

<pallas_src>
import functools

import jax
import jax.numpy as jnp
from jax import lax
from jax.experimental import pallas as pl
from jax.experimental.pallas import tpu as pltpu  # noqa: F401  (TPU backend)


# ------------------------------ fused kernel ---------------------------------
def _fused_rnn_lm_kernel(tokens_ref, table_ref, *refs,
                         num_layers, seq_len, batch, hidden):
    """Refs layout (after tokens/table):
         per layer l:  w_ih_t (D_in,3H), w_hh_t (H,3H), bias (2,3H)=[b_ih;b_hh]
         then: fc_w_t (H,V), fc_b (1,V)
         output: out (N,V)
    """
    nl, t_steps, b, hsz = num_layers, seq_len, batch, hidden
    n_tok = t_steps * b
    vocab = table_ref.shape[0]

    layer_refs = [refs[3 * l: 3 * (l + 1)] for l in range(nl)]
    fc_w_ref = refs[3 * nl]
    fc_b_ref = refs[3 * nl + 1]
    out_ref = refs[3 * nl + 2]

    # ---- embedding gather as one one-hot MXU matmul (table VMEM-resident) ----
    # TODO(synk): out-of-range ids embed to zeros (nn.Embedding would error).
    tok = tokens_ref[...]                                            # (N, 1) int32
    onehot = (tok == lax.broadcasted_iota(jnp.int32, (n_tok, vocab), 1))
    x_flat = jnp.dot(onehot.astype(jnp.float32), table_ref[...],
                     preferred_element_type=jnp.float32)             # (N, D_embed)

    # ---- load weights once; fold b_hh_{r,z} into the gi-side bias -----------
    w_ih, w_hh, bias_gi, b_hh_n = [], [], [], []
    lane = lax.broadcasted_iota(jnp.int32, (1, 3 * hsz), 1)
    for l in range(nl):
        wih_ref, whh_ref, bias_ref = layer_refs[l]
        w_ih.append(wih_ref[...])                                    # (D_in, 3H)
        w_hh.append(whh_ref[...])                                    # (H, 3H)
        b_ih = bias_ref[0:1, :]                                      # (1, 3H)
        b_hh = bias_ref[1:2, :]                                      # (1, 3H)
        # only b_hh_n must stay inside the recurrence (it is scaled by r)
        bias_gi.append(b_ih + jnp.where(lane < 2 * hsz, b_hh, 0.0))  # (1, 3H)
        b_hh_n.append(b_hh[:, 2 * hsz:])                             # (1, H)

    # ---- layer-0 input projection hoisted for ALL timesteps (off serial path)
    gi0 = jnp.dot(x_flat, w_ih[0],
                  preferred_element_type=jnp.float32) + bias_gi[0]   # (N, 3H)

    def gru_cell(l, gi_t, h):
        # single fused (B,H)@(H,3H) hidden-side matmul per step
        gh = jnp.dot(h, w_hh[l], preferred_element_type=jnp.float32)  # (B, 3H)
        # one sigmoid over the concatenated r|z block (b_hh_{r,z} already folded)
        rz = jax.nn.sigmoid(gi_t[:, :2 * hsz] + gh[:, :2 * hsz])
        r, z = rz[:, :hsz], rz[:, hsz:]
        n = jnp.tanh(gi_t[:, 2 * hsz:] + r * (gh[:, 2 * hsz:] + b_hh_n[l]))
        return (1.0 - z) * n + z * h

    # ---- wavefront over (layer, time): layer l handles t = s - l at step s ---
    # The nl independent recurrences overlap on the MXU/EUP instead of running
    # sequentially.  h states live in vregs; no VMEM scratch is used.
    h_state = [jnp.zeros((b, hsz), jnp.float32) for _ in range(nl)]  # h0 = 0
    outs = [None] * t_steps
    for s in range(t_steps + nl - 1):
        prev = list(h_state)              # snapshot: layer l-1 output at time s-l
        for l in range(nl):
            t = s - l
            if not (0 <= t < t_steps):
                continue
            if l == 0:
                gi_t = gi0[t * b:(t + 1) * b, :]                     # static slice
            else:
                # per-step input projection for upper layers; independent of this
                # layer's hidden chain, so its latency hides under layer l-1.
                gi_t = jnp.dot(prev[l - 1], w_ih[l],
                               preferred_element_type=jnp.float32) + bias_gi[l]
            h_state[l] = gru_cell(l, gi_t, h_state[l])
            if l == nl - 1:
                outs[t] = h_state[l]

    x_out = jnp.concatenate(outs, axis=0)                            # (N, H)

    # ---- fc1 + log_softmax (single lane-dense (N, V) store) -----------------
    logits = jnp.dot(x_out, fc_w_ref[...],
                     preferred_element_type=jnp.float32) + fc_b_ref[...]
    m = jnp.max(logits, axis=1, keepdims=True)
    sh = logits - m
    lse = jnp.log(jnp.sum(jnp.exp(sh), axis=1, keepdims=True))
    out_ref[...] = (sh - lse).astype(out_ref.dtype)


# --------------------------------- wrapper ------------------------------------
def rnn_lm_forward(tokens, params, seq_len, batch):
    t_steps, b = seq_len, batch
    n = t_steps * b
    table = params["embed"]
    v = table.shape[0]
    hsz = params["fc_w_t"].shape[0]
    num_layers = len(params["gru"])

    flat_args = [tokens.reshape(n, 1).astype(jnp.int32), table]
    for layer in params["gru"]:
        bias = jnp.stack([layer["b_ih"], layer["b_hh"]], axis=0)     # (2, 3H)
        flat_args += [layer["w_ih_t"], layer["w_hh_t"], bias]
    flat_args += [params["fc_w_t"], params["fc_b"].reshape(1, v)]

    kernel = functools.partial(_fused_rnn_lm_kernel,
                               num_layers=num_layers, seq_len=t_steps,
                               batch=b, hidden=hsz)
    # Gridless call: the whole problem (<100 KB) is VMEM-resident; no scratch.
    return pl.pallas_call(
        kernel,
        out_shape=jax.ShapeDtypeStruct((n, v), jnp.float32),
    )(*flat_args)


# ----------------------------- pure-JAX reference ----------------------------
def _gru_layer_ref(x, w_ih_t, w_hh_t, b_ih, b_hh):
    hsz = w_hh_t.shape[0]

    def step(h, x_t):
        gi = x_t @ w_ih_t + b_ih
        gh = h @ w_hh_t + b_hh
        r = jax.nn.sigmoid(gi[:, :hsz] + gh[:, :hsz])
        z = jax.nn.sigmoid(gi[:, hsz:2 * hsz] + gh[:, hsz:2 * hsz])
        nn_ = jnp.tanh(gi[:, 2 * hsz:] + r * gh[:, 2 * hsz:])
        h_new = (1.0 - z) * nn_ + z * h
        return h_new, h_new

    h0 = jnp.zeros((x.shape[1], hsz), jnp.float32)
    _, ys = jax.lax.scan(step, h0, x)
    return ys


def rnn_lm_forward_ref(tokens, params, seq_len, batch):
    x = jnp.take(params["embed"], tokens, axis=0).reshape(seq_len, batch, -1)
    for layer in params["gru"]:
        x = _gru_layer_ref(x, layer["w_ih_t"], layer["w_hh_t"],
                           layer["b_ih"], layer["b_hh"])
    logits = x.reshape(seq_len * batch, -1) @ params["fc_w_t"] + params["fc_b"]
    return jax.nn.log_softmax(logits, axis=1)


# ------------------------------------ main ------------------------------------
if __name__ == "__main__":
    # config
    nvocab, d_embed, rnn_hidden, rnn_layers = 128, 32, 32, 2
    T, B = 8, 8                 # uniform packed sequence: batch_sizes = [B]*T
    N = T * B

    key = jax.random.PRNGKey(0)
    keys = jax.random.split(key, 3 + 4 * rnn_layers)
    k_scale = 1.0 / jnp.sqrt(jnp.float32(rnn_hidden))

    params = {
        # nn.Embedding default init: N(0, 1)
        "embed": jax.random.normal(keys[0], (nvocab, d_embed), jnp.float32),
        "gru": [],
        # nn.Linear(rnn_hidden, nvocab): store transposed weight (H, V)
        "fc_w_t": jax.random.uniform(keys[1], (rnn_hidden, nvocab), jnp.float32,
                                     -k_scale, k_scale),
        "fc_b": jax.random.uniform(keys[2], (nvocab,), jnp.float32,
                                   -k_scale, k_scale),
    }
    for l in range(rnn_layers):
        d_in = d_embed if l == 0 else rnn_hidden
        ka, kb, kc, kd = keys[3 + 4 * l: 3 + 4 * (l + 1)]
        params["gru"].append({
            # PyTorch stores (3H, D_in)/(3H, H); keep pre-transposed for MXU.
            "w_ih_t": jax.random.uniform(ka, (d_in, 3 * rnn_hidden), jnp.float32,
                                         -k_scale, k_scale),
            "w_hh_t": jax.random.uniform(kb, (rnn_hidden, 3 * rnn_hidden),
                                         jnp.float32, -k_scale, k_scale),
            "b_ih": jax.random.uniform(kc, (3 * rnn_hidden,), jnp.float32,
                                       -k_scale, k_scale),
            "b_hh": jax.random.uniform(kd, (3 * rnn_hidden,), jnp.float32,
                                       -k_scale, k_scale),
        })

    tokens = jax.random.randint(jax.random.PRNGKey(42), (N,), 0, nvocab, jnp.int32)

    fwd = jax.jit(functools.partial(rnn_lm_forward, seq_len=T, batch=B))
    out = fwd(tokens, params)
    out = jax.block_until_ready(out)

    ref = rnn_lm_forward_ref(tokens, params, T, B)
    assert out.shape == (N, nvocab)
    assert jnp.allclose(out, ref, atol=1e-3, rtol=1e-3), "mismatch vs JAX reference"

    print("KERNEL_OK")
</pallas_src>

<mosaic_0001>
module attributes {stable_mosaic.version = 11 : i64} {
  func.func @_fused_rnn_lm_kernel(%arg0: memref<64x1xi32, #tpu.memory_space<vmem>>, %arg1: memref<128x32xf32, #tpu.memory_space<vmem>>, %arg2: memref<32x96xf32, #tpu.memory_space<vmem>>, %arg3: memref<32x96xf32, #tpu.memory_space<vmem>>, %arg4: memref<2x96xf32, #tpu.memory_space<vmem>>, %arg5: memref<32x96xf32, #tpu.memory_space<vmem>>, %arg6: memref<32x96xf32, #tpu.memory_space<vmem>>, %arg7: memref<2x96xf32, #tpu.memory_space<vmem>>, %arg8: memref<32x128xf32, #tpu.memory_space<vmem>>, %arg9: memref<1x128xf32, #tpu.memory_space<vmem>>, %arg10: memref<64x128xf32, #tpu.memory_space<vmem>>) attributes {dimension_semantics = [], scalar_prefetch = 0 : i64, scratch_operands = 0 : i64, tpu.core_type = #tpu.core_type<tc>} {
    %c0 = arith.constant 0 : index
    %c0_0 = arith.constant 0 : index
    %0 = vector.load %arg0[%c0, %c0_0] : memref<64x1xi32, #tpu.memory_space<vmem>>, vector<64x1xi32>
    %1 = tpu.iota {dimensions = array<i32: 1>} : vector<64x128xi32>
    %2 = vector.broadcast %0 : vector<64x1xi32> to vector<64x128xi32>
    %3 = arith.cmpi eq, %2, %1 : vector<64x128xi32>
    %4 = arith.extui %3 : vector<64x128xi1> to vector<64x128xi32>
    %5 = arith.sitofp %4 : vector<64x128xi32> to vector<64x128xf32>
    %c0_1 = arith.constant 0 : index
    %c0_2 = arith.constant 0 : index
    %6 = vector.load %arg1[%c0_1, %c0_2] : memref<128x32xf32, #tpu.memory_space<vmem>>, vector<128x32xf32>
    %cst = arith.constant dense<0.000000e+00> : vector<64x32xf32>
    %7 = tpu.matmul %5, %6, %cst {dimension_numbers = #tpu.dot_dimension_numbers<[1], [0], [0], [1], [0, 0, 1, 1], [], []>} : vector<64x128xf32>, vector<128x32xf32>, vector<64x32xf32> -> vector<64x32xf32>
    %8 = tpu.iota {dimensions = array<i32: 1>} : vector<1x96xi32>
    %c0_3 = arith.constant 0 : index
    %c0_4 = arith.constant 0 : index
    %9 = vector.load %arg2[%c0_3, %c0_4] : memref<32x96xf32, #tpu.memory_space<vmem>>, vector<32x96xf32>
    %c0_5 = arith.constant 0 : index
    %c0_6 = arith.constant 0 : index
    %10 = vector.load %arg3[%c0_5, %c0_6] : memref<32x96xf32, #tpu.memory_space<vmem>>, vector<32x96xf32>
    %c0_7 = arith.constant 0 : index
    %c0_8 = arith.constant 0 : index
    %11 = vector.load %arg4[%c0_7, %c0_8] : memref<2x96xf32, #tpu.memory_space<vmem>>, vector<1x96xf32>
    %c1 = arith.constant 1 : index
    %c0_9 = arith.constant 0 : index
    %12 = vector.load %arg4[%c1, %c0_9] : memref<2x96xf32, #tpu.memory_space<vmem>>, vector<1x96xf32>
    %c64_i32 = arith.constant 64 : i32
    %13 = vector.broadcast %c64_i32 : i32 to vector<1x96xi32>
    %14 = arith.cmpi slt, %8, %13 : vector<1x96xi32>
    %cst_10 = arith.constant 0.000000e+00 : f32
    %15 = vector.broadcast %cst_10 : f32 to vector<1x96xf32>
    %16 = arith.select %14, %12, %15 : vector<1x96xi1>, vector<1x96xf32>
    %17 = arith.addf %11, %16 : vector<1x96xf32>
    %18 = vector.extract_strided_slice %12 {offsets = [0, 64], sizes = [1, 32], strides = [1, 1]} : vector<1x96xf32> to vector<1x32xf32>
    %c0_11 = arith.constant 0 : index
    %c0_12 = arith.constant 0 : index
    %19 = vector.load %arg5[%c0_11, %c0_12] : memref<32x96xf32, #tpu.memory_space<vmem>>, vector<32x96xf32>
    %c0_13 = arith.constant 0 : index
    %c0_14 = arith.constant 0 : index
    %20 = vector.load %arg6[%c0_13, %c0_14] : memref<32x96xf32, #tpu.memory_space<vmem>>, vector<32x96xf32>
    %c0_15 = arith.constant 0 : index
    %c0_16 = arith.constant 0 : index
    %21 = vector.load %arg7[%c0_15, %c0_16] : memref<2x96xf32, #tpu.memory_space<vmem>>, vector<1x96xf32>
    %c1_17 = arith.constant 1 : index
    %c0_18 = arith.constant 0 : index
    %22 = vector.load %arg7[%c1_17, %c0_18] : memref<2x96xf32, #tpu.memory_space<vmem>>, vector<1x96xf32>
    %c64_i32_19 = arith.constant 64 : i32
    %23 = vector.broadcast %c64_i32_19 : i32 to vector<1x96xi32>
    %24 = arith.cmpi slt, %8, %23 : vector<1x96xi32>
    %cst_20 = arith.constant 0.000000e+00 : f32
    %25 = vector.broadcast %cst_20 : f32 to vector<1x96xf32>
    %26 = arith.select %24, %22, %25 : vector<1x96xi1>, vector<1x96xf32>
    %27 = arith.addf %21, %26 : vector<1x96xf32>
    %28 = vector.extract_strided_slice %22 {offsets = [0, 64], sizes = [1, 32], strides = [1, 1]} : vector<1x96xf32> to vector<1x32xf32>
    %cst_21 = arith.constant dense<0.000000e+00> : vector<64x96xf32>
    %29 = tpu.matmul %7, %9, %cst_21 {dimension_numbers = #tpu.dot_dimension_numbers<[1], [0], [0], [1], [0, 0, 1, 1], [], []>} : vector<64x32xf32>, vector<32x96xf32>, vector<64x96xf32> -> vector<64x96xf32>
    %30 = vector.broadcast %17 : vector<1x96xf32> to vector<64x96xf32>
    %31 = arith.addf %29, %30 : vector<64x96xf32>
    %cst_22 = arith.constant 0.000000e+00 : f32
    %32 = vector.broadcast %cst_22 : f32 to vector<8x32xf32>
    %cst_23 = arith.constant 0.000000e+00 : f32
    %33 = vector.broadcast %cst_23 : f32 to vector<8x32xf32>
    %34 = vector.extract_strided_slice %31 {offsets = [0, 0], sizes = [8, 96], strides = [1, 1]} : vector<64x96xf32> to vector<8x96xf32>
    %cst_24 = arith.constant dense<0.000000e+00> : vector<8x96xf32>
    %35 = tpu.matmul %32, %10, %cst_24 {dimension_numbers = #tpu.dot_dimension_numbers<[1], [0], [0], [1], [0, 0, 1, 1], [], []>} : vector<8x32xf32>, vector<32x96xf32>, vector<8x96xf32> -> vector<8x96xf32>
    %36 = vector.extract_strided_slice %34 {offsets = [0, 0], sizes = [8, 64], strides = [1, 1]} : vector<8x96xf32> to vector<8x64xf32>
    %37 = vector.extract_strided_slice %35 {offsets = [0, 0], sizes = [8, 64], strides = [1, 1]} : vector<8x96xf32> to vector<8x64xf32>
    %38 = arith.addf %36, %37 : vector<8x64xf32>
    %39 = arith.negf %38 : vector<8x64xf32>
    %40 = math.exp %39 : vector<8x64xf32>
    %cst_25 = arith.constant 1.000000e+00 : f32
    %41 = vector.broadcast %cst_25 : f32 to vector<8x64xf32>
    %42 = arith.addf %41, %40 : vector<8x64xf32>
    %43 = arith.divf %41, %42 : vector<8x64xf32>
    %44 = vector.extract_strided_slice %43 {offsets = [0, 0], sizes = [8, 32], strides = [1, 1]} : vector<8x64xf32> to vector<8x32xf32>
    %45 = vector.extract_strided_slice %43 {offsets = [0, 32], sizes = [8, 32], strides = [1, 1]} : vector<8x64xf32> to vector<8x32xf32>
    %46 = vector.extract_strided_slice %34 {offsets = [0, 64], sizes = [8, 32], strides = [1, 1]} : vector<8x96xf32> to vector<8x32xf32>
    %47 = vector.extract_strided_slice %35 {offsets = [0, 64], sizes = [8, 32], strides = [1, 1]} : vector<8x96xf32> to vector<8x32xf32>
    %48 = vector.broadcast %18 : vector<1x32xf32> to vector<8x32xf32>
    %49 = arith.addf %47, %48 : vector<8x32xf32>
    %50 = arith.mulf %44, %49 : vector<8x32xf32>
    %51 = arith.addf %46, %50 : vector<8x32xf32>
    %52 = math.tanh %51 : vector<8x32xf32>
    %cst_26 = arith.constant 1.000000e+00 : f32
    %53 = vector.broadcast %cst_26 : f32 to vector<8x32xf32>
    %54 = arith.subf %53, %45 : vector<8x32xf32>
    %55 = arith.mulf %54, %52 : vector<8x32xf32>
    %56 = arith.mulf %45, %32 : vector<8x32xf32>
    %57 = arith.addf %55, %56 : vector<8x32xf32>
    %58 = vector.extract_strided_slice %31 {offsets = [8, 0], sizes = [8, 96], strides = [1, 1]} : vector<64x96xf32> to vector<8x96xf32>
    %cst_27 = arith.constant dense<0.000000e+00> : vector<8x96xf32>
    %59 = tpu.matmul %57, %10, %cst_27 {dimension_numbers = #tpu.dot_dimension_numbers<[1], [0], [0], [1], [0, 0, 1, 1], [], []>} : vector<8x32xf32>, vector<32x96xf32>, vector<8x96xf32> -> vector<8x96xf32>
    %60 = vector.extract_strided_slice %58 {offsets = [0, 0], sizes = [8, 64], strides = [1, 1]} : vector<8x96xf32> to vector<8x64xf32>
    %61 = vector.extract_strided_slice %59 {offsets = [0, 0], sizes = [8, 64], strides = [1, 1]} : vector<8x96xf32> to vector<8x64xf32>
    %62 = arith.addf %60, %61 : vector<8x64xf32>
    %63 = arith.negf %62 : vector<8x64xf32>
    %64 = math.exp %63 : vector<8x64xf32>
    %cst_28 = arith.constant 1.000000e+00 : f32
    %65 = vector.broadcast %cst_28 : f32 to vector<8x64xf32>
    %66 = arith.addf %65, %64 : vector<8x64xf32>
    %67 = arith.divf %65, %66 : vector<8x64xf32>
    %68 = vector.extract_strided_slice %67 {offsets = [0, 0], sizes = [8, 32], strides = [1, 1]} : vector<8x64xf32> to vector<8x32xf32>
    %69 = vector.extract_strided_slice %67 {offsets = [0, 32], sizes = [8, 32], strides = [1, 1]} : vector<8x64xf32> to vector<8x32xf32>
    %70 = vector.extract_strided_slice %58 {offsets = [0, 64], sizes = [8, 32], strides = [1, 1]} : vector<8x96xf32> to vector<8x32xf32>
    %71 = vector.extract_strided_slice %59 {offsets = [0, 64], sizes = [8, 32], strides = [1, 1]} : vector<8x96xf32> to vector<8x32xf32>
    %72 = vector.broadcast %18 : vector<1x32xf32> to vector<8x32xf32>
    %73 = arith.addf %71, %72 : vector<8x32xf32>
    %74 = arith.mulf %68, %73 : vector<8x32xf32>
    %75 = arith.addf %70, %74 : vector<8x32xf32>
    %76 = math.tanh %75 : vector<8x32xf32>
    %cst_29 = arith.constant 1.000000e+00 : f32
    %77 = vector.broadcast %cst_29 : f32 to vector<8x32xf32>
    %78 = arith.subf %77, %69 : vector<8x32xf32>
    %79 = arith.mulf %78, %76 : vector<8x32xf32>
    %80 = arith.mulf %69, %57 : vector<8x32xf32>
    %81 = arith.addf %79, %80 : vector<8x32xf32>
    %cst_30 = arith.constant dense<0.000000e+00> : vector<8x96xf32>
    %82 = tpu.matmul %57, %19, %cst_30 {dimension_numbers = #tpu.dot_dimension_numbers<[1], [0], [0], [1], [0, 0, 1, 1], [], []>} : vector<8x32xf32>, vector<32x96xf32>, vector<8x96xf32> -> vector<8x96xf32>
    %83 = vector.broadcast %27 : vector<1x96xf32> to vector<8x96xf32>
    %84 = arith.addf %82, %83 : vector<8x96xf32>
    %cst_31 = arith.constant dense<0.000000e+00> : vector<8x96xf32>
    %85 = tpu.matmul %33, %20, %cst_31 {dimension_numbers = #tpu.dot_dimension_numbers<[1], [0], [0], [1], [0, 0, 1, 1], [], []>} : vector<8x32xf32>, vector<32x96xf32>, vector<8x96xf32> -> vector<8x96xf32>
    %86 = vector.extract_strided_slice %84 {offsets = [0, 0], sizes = [8, 64], strides = [1, 1]} : vector<8x96xf32> to vector<8x64xf32>
    %87 = vector.extract_strided_slice %85 {offsets = [0, 0], sizes = [8, 64], strides = [1, 1]} : vector<8x96xf32> to vector<8x64xf32>
    %88 = arith.addf %86, %87 : vector<8x64xf32>
    %89 = arith.negf %88 : vector<8x64xf32>
    %90 = math.exp %89 : vector<8x64xf32>
    %cst_32 = arith.constant 1.000000e+00 : f32
    %91 = vector.broadcast %cst_32 : f32 to vector<8x64xf32>
    %92 = arith.addf %91, %90 : vector<8x64xf32>
    %93 = arith.divf %91, %92 : vector<8x64xf32>
    %94 = vector.extract_strided_slice %93 {offsets = [0, 0], sizes = [8, 32], strides = [1, 1]} : vector<8x64xf32> to vector<8x32xf32>
    %95 = vector.extract_strided_slice %93 {offsets = [0, 32], sizes = [8, 32], strides = [1, 1]} : vector<8x64xf32> to vector<8x32xf32>
    %96 = vector.extract_strided_slice %84 {offsets = [0, 64], sizes = [8, 32], strides = [1, 1]} : vector<8x96xf32> to vector<8x32xf32>
    %97 = vector.extract_strided_slice %85 {offsets = [0, 64], sizes = [8, 32], strides = [1, 1]} : vector<8x96xf32> to vector<8x32xf32>
    %98 = vector.broadcast %28 : vector<1x32xf32> to vector<8x32xf32>
    %99 = arith.addf %97, %98 : vector<8x32xf32>
    %100 = arith.mulf %94, %99 : vector<8x32xf32>
    %101 = arith.addf %96, %100 : vector<8x32xf32>
    %102 = math.tanh %101 : vector<8x32xf32>
    %cst_33 = arith.constant 1.000000e+00 : f32
    %103 = vector.broadcast %cst_33 : f32 to vector<8x32xf32>
    %104 = arith.subf %103, %95 : vector<8x32xf32>
    %105 = arith.mulf %104, %102 : vector<8x32xf32>
    %106 = arith.mulf %95, %33 : vector<8x32xf32>
    %107 = arith.addf %105, %106 : vector<8x32xf32>
    %108 = vector.extract_strided_slice %31 {offsets = [16, 0], sizes = [8, 96], strides = [1, 1]} : vector<64x96xf32> to vector<8x96xf32>
    %cst_34 = arith.constant dense<0.000000e+00> : vector<8x96xf32>
    %109 = tpu.matmul %81, %10, %cst_34 {dimension_numbers = #tpu.dot_dimension_numbers<[1], [0], [0], [1], [0, 0, 1, 1], [], []>} : vector<8x32xf32>, vector<32x96xf32>, vector<8x96xf32> -> vector<8x96xf32>
    %110 = vector.extract_strided_slice %108 {offsets = [0, 0], sizes = [8, 64], strides = [1, 1]} : vector<8x96xf32> to vector<8x64xf32>
    %111 = vector.extract_strided_slice %109 {offsets = [0, 0], sizes = [8, 64], strides = [1, 1]} : vector<8x96xf32> to vector<8x64xf32>
    %112 = arith.addf %110, %111 : vector<8x64xf32>
    %113 = arith.negf %112 : vector<8x64xf32>
    %114 = math.exp %113 : vector<8x64xf32>
    %cst_35 = arith.constant 1.000000e+00 : f32
    %115 = vector.broadcast %cst_35 : f32 to vector<8x64xf32>
    %116 = arith.addf %115, %114 : vector<8x64xf32>
    %117 = arith.divf %115, %116 : vector<8x64xf32>
    %118 = vector.extract_strided_slice %117 {offsets = [0, 0], sizes = [8, 32], strides = [1, 1]} : vector<8x64xf32> to vector<8x32xf32>
    %119 = vector.extract_strided_slice %117 {offsets = [0, 32], sizes = [8, 32], strides = [1, 1]} : vector<8x64xf32> to vector<8x32xf32>
    %120 = vector.extract_strided_slice %108 {offsets = [0, 64], sizes = [8, 32], strides = [1, 1]} : vector<8x96xf32> to vector<8x32xf32>
    %121 = vector.extract_strided_slice %109 {offsets = [0, 64], sizes = [8, 32], strides = [1, 1]} : vector<8x96xf32> to vector<8x32xf32>
    %122 = vector.broadcast %18 : vector<1x32xf32> to vector<8x32xf32>
    %123 = arith.addf %121, %122 : vector<8x32xf32>
    %124 = arith.mulf %118, %123 : vector<8x32xf32>
    %125 = arith.addf %120, %124 : vector<8x32xf32>
    %126 = math.tanh %125 : vector<8x32xf32>
    %cst_36 = arith.constant 1.000000e+00 : f32
    %127 = vector.broadcast %cst_36 : f32 to vector<8x32xf32>
    %128 = arith.subf %127, %119 : vector<8x32xf32>
    %129 = arith.mulf %128, %126 : vector<8x32xf32>
    %130 = arith.mulf %119, %81 : vector<8x32xf32>
    %131 = arith.addf %129, %130 : vector<8x32xf32>
    %cst_37 = arith.constant dense<0.000000e+00> : vector<8x96xf32>
    %132 = tpu.matmul %81, %19, %cst_37 {dimension_numbers = #tpu.dot_dimension_numbers<[1], [0], [0], [1], [0, 0, 1, 1], [], []>} : vector<8x32xf32>, vector<32x96xf32>, vector<8x96xf32> -> vector<8x96xf32>
    %133 = vector.broadcast %27 : vector<1x96xf32> to vector<8x96xf32>
    %134 = arith.addf %132, %133 : vector<8x96xf32>
    %cst_38 = arith.constant dense<0.000000e+00> : vector<8x96xf32>
    %135 = tpu.matmul %107, %20, %cst_38 {dimension_numbers = #tpu.dot_dimension_numbers<[1], [0], [0], [1], [0, 0, 1, 1], [], []>} : vector<8x32xf32>, vector<32x96xf32>, vector<8x96xf32> -> vector<8x96xf32>
    %136 = vector.extract_strided_slice %134 {offsets = [0, 0], sizes = [8, 64], strides = [1, 1]} : vector<8x96xf32> to vector<8x64xf32>
    %137 = vector.extract_strided_slice %135 {offsets = [0, 0], sizes = [8, 64], strides = [1, 1]} : vector<8x96xf32> to vector<8x64xf32>
    %138 = arith.addf %136, %137 : vector<8x64xf32>
    %139 = arith.negf %138 : vector<8x64xf32>
    %140 = math.exp %139 : vector<8x64xf32>
    %cst_39 = arith.constant 1.000000e+00 : f32
    %141 = vector.broadcast %cst_39 : f32 to vector<8x64xf32>
    %142 = arith.addf %141, %140 : vector<8x64xf32>
    %143 = arith.divf %141, %142 : vector<8x64xf32>
    %144 = vector.extract_strided_slice %143 {offsets = [0, 0], sizes = [8, 32], strides = [1, 1]} : vector<8x64xf32> to vector<8x32xf32>
    %145 = vector.extract_strided_slice %143 {offsets = [0, 32], sizes = [8, 32], strides = [1, 1]} : vector<8x64xf32> to vector<8x32xf32>
    %146 = vector.extract_strided_slice %134 {offsets = [0, 64], sizes = [8, 32], strides = [1, 1]} : vector<8x96xf32> to vector<8x32xf32>
    %147 = vector.extract_strided_slice %135 {offsets = [0, 64], sizes = [8, 32], strides = [1, 1]} : vector<8x96xf32> to vector<8x32xf32>
    %148 = vector.broadcast %28 : vector<1x32xf32> to vector<8x32xf32>
    %149 = arith.addf %147, %148 : vector<8x32xf32>
    %150 = arith.mulf %144, %149 : vector<8x32xf32>
    %151 = arith.addf %146, %150 : vector<8x32xf32>
    %152 = math.tanh %151 : vector<8x32xf32>
    %cst_40 = arith.constant 1.000000e+00 : f32
    %153 = vector.broadcast %cst_40 : f32 to vector<8x32xf32>
    %154 = arith.subf %153, %145 : vector<8x32xf32>
    %155 = arith.mulf %154, %152 : vector<8x32xf32>
    %156 = arith.mulf %145, %107 : vector<8x32xf32>
    %157 = arith.addf %155, %156 : vector<8x32xf32>
    %158 = vector.extract_strided_slice %31 {offsets = [24, 0], sizes = [8, 96], strides = [1, 1]} : vector<64x96xf32> to vector<8x96xf32>
    %cst_41 = arith.constant dense<0.000000e+00> : vector<8x96xf32>
    %159 = tpu.matmul %131, %10, %cst_41 {dimension_numbers = #tpu.dot_dimension_numbers<[1], [0], [0], [1], [0, 0, 1, 1], [], []>} : vector<8x32xf32>, vector<32x96xf32>, vector<8x96xf32> -> vector<8x96xf32>
    %160 = vector.extract_strided_slice %158 {offsets = [0, 0], sizes = [8, 64], strides = [1, 1]} : vector<8x96xf32> to vector<8x64xf32>
    %161 = vector.extract_strided_slice %159 {offsets = [0, 0], sizes = [8, 64], strides = [1, 1]} : vector<8x96xf32> to vector<8x64xf32>
    %162 = arith.addf %160, %161 : vector<8x64xf32>
    %163 = arith.negf %162 : vector<8x64xf32>
    %164 = math.exp %163 : vector<8x64xf32>
    %cst_42 = arith.constant 1.000000e+00 : f32
    %165 = vector.broadcast %cst_42 : f32 to vector<8x64xf32>
    %166 = arith.addf %165, %164 : vector<8x64xf32>
    %167 = arith.divf %165, %166 : vector<8x64xf32>
    %168 = vector.extract_strided_slice %167 {offsets = [0, 0], sizes = [8, 32], strides = [1, 1]} : vector<8x64xf32> to vector<8x32xf32>
    %169 = vector.extract_strided_slice %167 {offsets = [0, 32], sizes = [8, 32], strides = [1, 1]} : vector<8x64xf32> to vector<8x32xf32>
    %170 = vector.extract_strided_slice %158 {offsets = [0, 64], sizes = [8, 32], strides = [1, 1]} : vector<8x96xf32> to vector<8x32xf32>
    %171 = vector.extract_strided_slice %159 {offsets = [0, 64], sizes = [8, 32], strides = [1, 1]} : vector<8x96xf32> to vector<8x32xf32>
    %172 = vector.broadcast %18 : vector<1x32xf32> to vector<8x32xf32>
    %173 = arith.addf %171, %172 : vector<8x32xf32>
    %174 = arith.mulf %168, %173 : vector<8x32xf32>
    %175 = arith.addf %170, %174 : vector<8x32xf32>
    %176 = math.tanh %175 : vector<8x32xf32>
    %cst_43 = arith.constant 1.000000e+00 : f32
    %177 = vector.broadcast %cst_43 : f32 to vector<8x32xf32>
    %178 = arith.subf %177, %169 : vector<8x32xf32>
    %179 = arith.mulf %178, %176 : vector<8x32xf32>
    %180 = arith.mulf %169, %131 : vector<8x32xf32>
    %181 = arith.addf %179, %180 : vector<8x32xf32>
    %cst_44 = arith.constant dense<0.000000e+00> : vector<8x96xf32>
    %182 = tpu.matmul %131, %19, %cst_44 {dimension_numbers = #tpu.dot_dimension_numbers<[1], [0], [0], [1], [0, 0, 1, 1], [], []>} : vector<8x32xf32>, vector<32x96xf32>, vector<8x96xf32> -> vector<8x96xf32>
    %183 = vector.broadcast %27 : vector<1x96xf32> to vector<8x96xf32>
    %184 = arith.addf %182, %183 : vector<8x96xf32>
    %cst_45 = arith.constant dense<0.000000e+00> : vector<8x96xf32>
    %185 = tpu.matmul %157, %20, %cst_45 {dimension_numbers = #tpu.dot_dimension_numbers<[1], [0], [0], [1], [0, 0, 1, 1], [], []>} : vector<8x32xf32>, vector<32x96xf32>, vector<8x96xf32> -> vector<8x96xf32>
    %186 = vector.extract_strided_slice %184 {offsets = [0, 0], sizes = [8, 64], strides = [1, 1]} : vector<8x96xf32> to vector<8x64xf32>
    %187 = vector.extract_strided_slice %185 {offsets = [0, 0], sizes = [8, 64], strides = [1, 1]} : vector<8x96xf32> to vector<8x64xf32>
    %188 = arith.addf %186, %187 : vector<8x64xf32>
    %189 = arith.negf %188 : vector<8x64xf32>
    %190 = math.exp %189 : vector<8x64xf32>
    %cst_46 = arith.constant 1.000000e+00 : f32
    %191 = vector.broadcast %cst_46 : f32 to vector<8x64xf32>
    %192 = arith.addf %191, %190 : vector<8x64xf32>
    %193 = arith.divf %191, %192 : vector<8x64xf32>
    %194 = vector.extract_strided_slice %193 {offsets = [0, 0], sizes = [8, 32], strides = [1, 1]} : vector<8x64xf32> to vector<8x32xf32>
    %195 = vector.extract_strided_slice %193 {offsets = [0, 32], sizes = [8, 32], strides = [1, 1]} : vector<8x64xf32> to vector<8x32xf32>
    %196 = vector.extract_strided_slice %184 {offsets = [0, 64], sizes = [8, 32], strides = [1, 1]} : vector<8x96xf32> to vector<8x32xf32>
    %197 = vector.extract_strided_slice %185 {offsets = [0, 64], sizes = [8, 32], strides = [1, 1]} : vector<8x96xf32> to vector<8x32xf32>
    %198 = vector.broadcast %28 : vector<1x32xf32> to vector<8x32xf32>
    %199 = arith.addf %197, %198 : vector<8x32xf32>
    %200 = arith.mulf %194, %199 : vector<8x32xf32>
    %201 = arith.addf %196, %200 : vector<8x32xf32>
    %202 = math.tanh %201 : vector<8x32xf32>
    %cst_47 = arith.constant 1.000000e+00 : f32
    %203 = vector.broadcast %cst_47 : f32 to vector<8x32xf32>
    %204 = arith.subf %203, %195 : vector<8x32xf32>
    %205 = arith.mulf %204, %202 : vector<8x32xf32>
    %206 = arith.mulf %195, %157 : vector<8x32xf32>
    %207 = arith.addf %205, %206 : vector<8x32xf32>
    %208 = vector.extract_strided_slice %31 {offsets = [32, 0], sizes = [8, 96], strides = [1, 1]} : vector<64x96xf32> to vector<8x96xf32>
    %cst_48 = arith.constant dense<0.000000e+00> : vector<8x96xf32>
    %209 = tpu.matmul %181, %10, %cst_48 {dimension_numbers = #tpu.dot_dimension_numbers<[1], [0], [0], [1], [0, 0, 1, 1], [], []>} : vector<8x32xf32>, vector<32x96xf32>, vector<8x96xf32> -> vector<8x96xf32>
    %210 = vector.extract_strided_slice %208 {offsets = [0, 0], sizes = [8, 64], strides = [1, 1]} : vector<8x96xf32> to vector<8x64xf32>
    %211 = vector.extract_strided_slice %209 {offsets = [0, 0], sizes = [8, 64], strides = [1, 1]} : vector<8x96xf32> to vector<8x64xf32>
    %212 = arith.addf %210, %211 : vector<8x64xf32>
    %213 = arith.negf %212 : vector<8x64xf32>
    %214 = math.exp %213 : vector<8x64xf32>
    %cst_49 = arith.constant 1.000000e+00 : f32
    %215 = vector.broadcast %cst_49 : f32 to vector<8x64xf32>
    %216 = arith.addf %215, %214 : vector<8x64xf32>
    %217 = arith.divf %215, %216 : vector<8x64xf32>
    %218 = vector.extract_strided_slice %217 {offsets = [0, 0], sizes = [8, 32], strides = [1, 1]} : vector<8x64xf32> to vector<8x32xf32>
    %219 = vector.extract_strided_slice %217 {offsets = [0, 32], sizes = [8, 32], strides = [1, 1]} : vector<8x64xf32> to vector<8x32xf32>
    %220 = vector.extract_strided_slice %208 {offsets = [0, 64], sizes = [8, 32], strides = [1, 1]} : vector<8x96xf32> to vector<8x32xf32>
    %221 = vector.extract_strided_slice %209 {offsets = [0, 64], sizes = [8, 32], strides = [1, 1]} : vector<8x96xf32> to vector<8x32xf32>
    %222 = vector.broadcast %18 : vector<1x32xf32> to vector<8x32xf32>
    %223 = arith.addf %221, %222 : vector<8x32xf32>
    %224 = arith.mulf %218, %223 : vector<8x32xf32>
    %225 = arith.addf %220, %224 : vector<8x32xf32>
    %226 = math.tanh %225 : vector<8x32xf32>
    %cst_50 = arith.constant 1.000000e+00 : f32
    %227 = vector.broadcast %cst_50 : f32 to vector<8x32xf32>
    %228 = arith.subf %227, %219 : vector<8x32xf32>
    %229 = arith.mulf %228, %226 : vector<8x32xf32>
    %230 = arith.mulf %219, %181 : vector<8x32xf32>
    %231 = arith.addf %229, %230 : vector<8x32xf32>
    %cst_51 = arith.constant dense<0.000000e+00> : vector<8x96xf32>
    %232 = tpu.matmul %181, %19, %cst_51 {dimension_numbers = #tpu.dot_dimension_numbers<[1], [0], [0], [1], [0, 0, 1, 1], [], []>} : vector<8x32xf32>, vector<32x96xf32>, vector<8x96xf32> -> vector<8x96xf32>
    %233 = vector.broadcast %27 : vector<1x96xf32> to vector<8x96xf32>
    %234 = arith.addf %232, %233 : vector<8x96xf32>
    %cst_52 = arith.constant dense<0.000000e+00> : vector<8x96xf32>
    %235 = tpu.matmul %207, %20, %cst_52 {dimension_numbers = #tpu.dot_dimension_numbers<[1], [0], [0], [1], [0, 0, 1, 1], [], []>} : vector<8x32xf32>, vector<32x96xf32>, vector<8x96xf32> -> vector<8x96xf32>
    %236 = vector.extract_strided_slice %234 {offsets = [0, 0], sizes = [8, 64], strides = [1, 1]} : vector<8x96xf32> to vector<8x64xf32>
    %237 = vector.extract_strided_slice %235 {offsets = [0, 0], sizes = [8, 64], strides = [1, 1]} : vector<8x96xf32> to vector<8x64xf32>
    %238 = arith.addf %236, %237 : vector<8x64xf32>
    %239 = arith.negf %238 : vector<8x64xf32>
    %240 = math.exp %239 : vector<8x64xf32>
    %cst_53 = arith.constant 1.000000e+00 : f32
    %241 = vector.broadcast %cst_53 : f32 to vector<8x64xf32>
    %242 = arith.addf %241, %240 : vector<8x64xf32>
    %243 = arith.divf %241, %242 : vector<8x64xf32>
    %244 = vector.extract_strided_slice %243 {offsets = [0, 0], sizes = [8, 32], strides = [1, 1]} : vector<8x64xf32> to vector<8x32xf32>
    %245 = vector.extract_strided_slice %243 {offsets = [0, 32], sizes = [8, 32], strides = [1, 1]} : vector<8x64xf32> to vector<8x32xf32>
    %246 = vector.extract_strided_slice %234 {offsets = [0, 64], sizes = [8, 32], strides = [1, 1]} : vector<8x96xf32> to vector<8x32xf32>
    %247 = vector.extract_strided_slice %235 {offsets = [0, 64], sizes = [8, 32], strides = [1, 1]} : vector<8x96xf32> to vector<8x32xf32>
    %248 = vector.broadcast %28 : vector<1x32xf32> to vector<8x32xf32>
    %249 = arith.addf %247, %248 : vector<8x32xf32>
    %250 = arith.mulf %244, %249 : vector<8x32xf32>
    %251 = arith.addf %246, %250 : vector<8x32xf32>
    %252 = math.tanh %251 : vector<8x32xf32>
    %cst_54 = arith.constant 1.000000e+00 : f32
    %253 = vector.broadcast %cst_54 : f32 to vector<8x32xf32>
    %254 = arith.subf %253, %245 : vector<8x32xf32>
    %255 = arith.mulf %254, %252 : vector<8x32xf32>
    %256 = arith.mulf %245, %207 : vector<8x32xf32>
    %257 = arith.addf %255, %256 : vector<8x32xf32>
    %258 = vector.extract_strided_slice %31 {offsets = [40, 0], sizes = [8, 96], strides = [1, 1]} : vector<64x96xf32> to vector<8x96xf32>
    %cst_55 = arith.constant dense<0.000000e+00> : vector<8x96xf32>
    %259 = tpu.matmul %231, %10, %cst_55 {dimension_numbers = #tpu.dot_dimension_numbers<[1], [0], [0], [1], [0, 0, 1, 1], [], []>} : vector<8x32xf32>, vector<32x96xf32>, vector<8x96xf32> -> vector<8x96xf32>
    %260 = vector.extract_strided_slice %258 {offsets = [0, 0], sizes = [8, 64], strides = [1, 1]} : vector<8x96xf32> to vector<8x64xf32>
    %261 = vector.extract_strided_slice %259 {offsets = [0, 0], sizes = [8, 64], strides = [1, 1]} : vector<8x96xf32> to vector<8x64xf32>
    %262 = arith.addf %260, %261 : vector<8x64xf32>
    %263 = arith.negf %262 : vector<8x64xf32>
    %264 = math.exp %263 : vector<8x64xf32>
    %cst_56 = arith.constant 1.000000e+00 : f32
    %265 = vector.broadcast %cst_56 : f32 to vector<8x64xf32>
    %266 = arith.addf %265, %264 : vector<8x64xf32>
    %267 = arith.divf %265, %266 : vector<8x64xf32>
    %268 = vector.extract_strided_slice %267 {offsets = [0, 0], sizes = [8, 32], strides = [1, 1]} : vector<8x64xf32> to vector<8x32xf32>
    %269 = vector.extract_strided_slice %267 {offsets = [0, 32], sizes = [8, 32], strides = [1, 1]} : vector<8x64xf32> to vector<8x32xf32>
    %270 = vector.extract_strided_slice %258 {offsets = [0, 64], sizes = [8, 32], strides = [1, 1]} : vector<8x96xf32> to vector<8x32xf32>
    %271 = vector.extract_strided_slice %259 {offsets = [0, 64], sizes = [8, 32], strides = [1, 1]} : vector<8x96xf32> to vector<8x32xf32>
    %272 = vector.broadcast %18 : vector<1x32xf32> to vector<8x32xf32>
    %273 = arith.addf %271, %272 : vector<8x32xf32>
    %274 = arith.mulf %268, %273 : vector<8x32xf32>
    %275 = arith.addf %270, %274 : vector<8x32xf32>
    %276 = math.tanh %275 : vector<8x32xf32>
    %cst_57 = arith.constant 1.000000e+00 : f32
    %277 = vector.broadcast %cst_57 : f32 to vector<8x32xf32>
    %278 = arith.subf %277, %269 : vector<8x32xf32>
    %279 = arith.mulf %278, %276 : vector<8x32xf32>
    %280 = arith.mulf %269, %231 : vector<8x32xf32>
    %281 = arith.addf %279, %280 : vector<8x32xf32>
    %cst_58 = arith.constant dense<0.000000e+00> : vector<8x96xf32>
    %282 = tpu.matmul %231, %19, %cst_58 {dimension_numbers = #tpu.dot_dimension_numbers<[1], [0], [0], [1], [0, 0, 1, 1], [], []>} : vector<8x32xf32>, vector<32x96xf32>, vector<8x96xf32> -> vector<8x96xf32>
    %283 = vector.broadcast %27 : vector<1x96xf32> to vector<8x96xf32>
    %284 = arith.addf %282, %283 : vector<8x96xf32>
    %cst_59 = arith.constant dense<0.000000e+00> : vector<8x96xf32>
    %285 = tpu.matmul %257, %20, %cst_59 {dimension_numbers = #tpu.dot_dimension_numbers<[1], [0], [0], [1], [0, 0, 1, 1], [], []>} : vector<8x32xf32>, vector<32x96xf32>, vector<8x96xf32> -> vector<8x96xf32>
    %286 = vector.extract_strided_slice %284 {offsets = [0, 0], sizes = [8, 64], strides = [1, 1]} : vector<8x96xf32> to vector<8x64xf32>
    %287 = vector.extract_strided_slice %285 {offsets = [0, 0], sizes = [8, 64], strides = [1, 1]} : vector<8x96xf32> to vector<8x64xf32>
    %288 = arith.addf %286, %287 : vector<8x64xf32>
    %289 = arith.negf %288 : vector<8x64xf32>
    %290 = math.exp %289 : vector<8x64xf32>
    %cst_60 = arith.constant 1.000000e+00 : f32
    %291 = vector.broadcast %cst_60 : f32 to vector<8x64xf32>
    %292 = arith.addf %291, %290 : vector<8x64xf32>
    %293 = arith.divf %291, %292 : vector<8x64xf32>
    %294 = vector.extract_strided_slice %293 {offsets = [0, 0], sizes = [8, 32], strides = [1, 1]} : vector<8x64xf32> to vector<8x32xf32>
    %295 = vector.extract_strided_slice %293 {offsets = [0, 32], sizes = [8, 32], strides = [1, 1]} : vector<8x64xf32> to vector<8x32xf32>
    %296 = vector.extract_strided_slice %284 {offsets = [0, 64], sizes = [8, 32], strides = [1, 1]} : vector<8x96xf32> to vector<8x32xf32>
    %297 = vector.extract_strided_slice %285 {offsets = [0, 64], sizes = [8, 32], strides = [1, 1]} : vector<8x96xf32> to vector<8x32xf32>
    %298 = vector.broadcast %28 : vector<1x32xf32> to vector<8x32xf32>
    %299 = arith.addf %297, %298 : vector<8x32xf32>
    %300 = arith.mulf %294, %299 : vector<8x32xf32>
    %301 = arith.addf %296, %300 : vector<8x32xf32>
    %302 = math.tanh %301 : vector<8x32xf32>
    %cst_61 = arith.constant 1.000000e+00 : f32
    %303 = vector.broadcast %cst_61 : f32 to vector<8x32xf32>
    %304 = arith.subf %303, %295 : vector<8x32xf32>
    %305 = arith.mulf %304, %302 : vector<8x32xf32>
    %306 = arith.mulf %295, %257 : vector<8x32xf32>
    %307 = arith.addf %305, %306 : vector<8x32xf32>
    %308 = vector.extract_strided_slice %31 {offsets = [48, 0], sizes = [8, 96], strides = [1, 1]} : vector<64x96xf32> to vector<8x96xf32>
    %cst_62 = arith.constant dense<0.000000e+00> : vector<8x96xf32>
    %309 = tpu.matmul %281, %10, %cst_62 {dimension_numbers = #tpu.dot_dimension_numbers<[1], [0], [0], [1], [0, 0, 1, 1], [], []>} : vector<8x32xf32>, vector<32x96xf32>, vector<8x96xf32> -> vector<8x96xf32>
    %310 = vector.extract_strided_slice %308 {offsets = [0, 0], sizes = [8, 64], strides = [1, 1]} : vector<8x96xf32> to vector<8x64xf32>
    %311 = vector.extract_strided_slice %309 {offsets = [0, 0], sizes = [8, 64], strides = [1, 1]} : vector<8x96xf32> to vector<8x64xf32>
    %312 = arith.addf %310, %311 : vector<8x64xf32>
    %313 = arith.negf %312 : vector<8x64xf32>
    %314 = math.exp %313 : vector<8x64xf32>
    %cst_63 = arith.constant 1.000000e+00 : f32
    %315 = vector.broadcast %cst_63 : f32 to vector<8x64xf32>
    %316 = arith.addf %315, %314 : vector<8x64xf32>
    %317 = arith.divf %315, %316 : vector<8x64xf32>
    %318 = vector.extract_strided_slice %317 {offsets = [0, 0], sizes = [8, 32], strides = [1, 1]} : vector<8x64xf32> to vector<8x32xf32>
    %319 = vector.extract_strided_slice %317 {offsets = [0, 32], sizes = [8, 32], strides = [1, 1]} : vector<8x64xf32> to vector<8x32xf32>
    %320 = vector.extract_strided_slice %308 {offsets = [0, 64], sizes = [8, 32], strides = [1, 1]} : vector<8x96xf32> to vector<8x32xf32>
    %321 = vector.extract_strided_slice %309 {offsets = [0, 64], sizes = [8, 32], strides = [1, 1]} : vector<8x96xf32> to vector<8x32xf32>
    %322 = vector.broadcast %18 : vector<1x32xf32> to vector<8x32xf32>
    %323 = arith.addf %321, %322 : vector<8x32xf32>
    %324 = arith.mulf %318, %323 : vector<8x32xf32>
    %325 = arith.addf %320, %324 : vector<8x32xf32>
    %326 = math.tanh %325 : vector<8x32xf32>
    %cst_64 = arith.constant 1.000000e+00 : f32
    %327 = vector.broadcast %cst_64 : f32 to vector<8x32xf32>
    %328 = arith.subf %327, %319 : vector<8x32xf32>
    %329 = arith.mulf %328, %326 : vector<8x32xf32>
    %330 = arith.mulf %319, %281 : vector<8x32xf32>
    %331 = arith.addf %329, %330 : vector<8x32xf32>
    %cst_65 = arith.constant dense<0.000000e+00> : vector<8x96xf32>
    %332 = tpu.matmul %281, %19, %cst_65 {dimension_numbers = #tpu.dot_dimension_numbers<[1], [0], [0], [1], [0, 0, 1, 1], [], []>} : vector<8x32xf32>, vector<32x96xf32>, vector<8x96xf32> -> vector<8x96xf32>
    %333 = vector.broadcast %27 : vector<1x96xf32> to vector<8x96xf32>
    %334 = arith.addf %332, %333 : vector<8x96xf32>
    %cst_66 = arith.constant dense<0.000000e+00> : vector<8x96xf32>
    %335 = tpu.matmul %307, %20, %cst_66 {dimension_numbers = #tpu.dot_dimension_numbers<[1], [0], [0], [1], [0, 0, 1, 1], [], []>} : vector<8x32xf32>, vector<32x96xf32>, vector<8x96xf32> -> vector<8x96xf32>
    %336 = vector.extract_strided_slice %334 {offsets = [0, 0], sizes = [8, 64], strides = [1, 1]} : vector<8x96xf32> to vector<8x64xf32>
    %337 = vector.extract_strided_slice %335 {offsets = [0, 0], sizes = [8, 64], strides = [1, 1]} : vector<8x96xf32> to vector<8x64xf32>
    %338 = arith.addf %336, %337 : vector<8x64xf32>
    %339 = arith.negf %338 : vector<8x64xf32>
    %340 = math.exp %339 : vector<8x64xf32>
    %cst_67 = arith.constant 1.000000e+00 : f32
    %341 = vector.broadcast %cst_67 : f32 to vector<8x64xf32>
    %342 = arith.addf %341, %340 : vector<8x64xf32>
    %343 = arith.divf %341, %342 : vector<8x64xf32>
    %344 = vector.extract_strided_slice %343 {offsets = [0, 0], sizes = [8, 32], strides = [1, 1]} : vector<8x64xf32> to vector<8x32xf32>
    %345 = vector.extract_strided_slice %343 {offsets = [0, 32], sizes = [8, 32], strides = [1, 1]} : vector<8x64xf32> to vector<8x32xf32>
    %346 = vector.extract_strided_slice %334 {offsets = [0, 64], sizes = [8, 32], strides = [1, 1]} : vector<8x96xf32> to vector<8x32xf32>
    %347 = vector.extract_strided_slice %335 {offsets = [0, 64], sizes = [8, 32], strides = [1, 1]} : vector<8x96xf32> to vector<8x32xf32>
    %348 = vector.broadcast %28 : vector<1x32xf32> to vector<8x32xf32>
    %349 = arith.addf %347, %348 : vector<8x32xf32>
    %350 = arith.mulf %344, %349 : vector<8x32xf32>
    %351 = arith.addf %346, %350 : vector<8x32xf32>
    %352 = math.tanh %351 : vector<8x32xf32>
    %cst_68 = arith.constant 1.000000e+00 : f32
    %353 = vector.broadcast %cst_68 : f32 to vector<8x32xf32>
    %354 = arith.subf %353, %345 : vector<8x32xf32>
    %355 = arith.mulf %354, %352 : vector<8x32xf32>
    %356 = arith.mulf %345, %307 : vector<8x32xf32>
    %357 = arith.addf %355, %356 : vector<8x32xf32>
    %358 = vector.extract_strided_slice %31 {offsets = [56, 0], sizes = [8, 96], strides = [1, 1]} : vector<64x96xf32> to vector<8x96xf32>
    %cst_69 = arith.constant dense<0.000000e+00> : vector<8x96xf32>
    %359 = tpu.matmul %331, %10, %cst_69 {dimension_numbers = #tpu.dot_dimension_numbers<[1], [0], [0], [1], [0, 0, 1, 1], [], []>} : vector<8x32xf32>, vector<32x96xf32>, vector<8x96xf32> -> vector<8x96xf32>
    %360 = vector.extract_strided_slice %358 {offsets = [0, 0], sizes = [8, 64], strides = [1, 1]} : vector<8x96xf32> to vector<8x64xf32>
    %361 = vector.extract_strided_slice %359 {offsets = [0, 0], sizes = [8, 64], strides = [1, 1]} : vector<8x96xf32> to vector<8x64xf32>
    %362 = arith.addf %360, %361 : vector<8x64xf32>
    %363 = arith.negf %362 : vector<8x64xf32>
    %364 = math.exp %363 : vector<8x64xf32>
    %cst_70 = arith.constant 1.000000e+00 : f32
    %365 = vector.broadcast %cst_70 : f32 to vector<8x64xf32>
    %366 = arith.addf %365, %364 : vector<8x64xf32>
    %367 = arith.divf %365, %366 : vector<8x64xf32>
    %368 = vector.extract_strided_slice %367 {offsets = [0, 0], sizes = [8, 32], strides = [1, 1]} : vector<8x64xf32> to vector<8x32xf32>
    %369 = vector.extract_strided_slice %367 {offsets = [0, 32], sizes = [8, 32], strides = [1, 1]} : vector<8x64xf32> to vector<8x32xf32>
    %370 = vector.extract_strided_slice %358 {offsets = [0, 64], sizes = [8, 32], strides = [1, 1]} : vector<8x96xf32> to vector<8x32xf32>
    %371 = vector.extract_strided_slice %359 {offsets = [0, 64], sizes = [8, 32], strides = [1, 1]} : vector<8x96xf32> to vector<8x32xf32>
    %372 = vector.broadcast %18 : vector<1x32xf32> to vector<8x32xf32>
    %373 = arith.addf %371, %372 : vector<8x32xf32>
    %374 = arith.mulf %368, %373 : vector<8x32xf32>
    %375 = arith.addf %370, %374 : vector<8x32xf32>
    %376 = math.tanh %375 : vector<8x32xf32>
    %cst_71 = arith.constant 1.000000e+00 : f32
    %377 = vector.broadcast %cst_71 : f32 to vector<8x32xf32>
    %378 = arith.subf %377, %369 : vector<8x32xf32>
    %379 = arith.mulf %378, %376 : vector<8x32xf32>
    %380 = arith.mulf %369, %331 : vector<8x32xf32>
    %381 = arith.addf %379, %380 : vector<8x32xf32>
    %cst_72 = arith.constant dense<0.000000e+00> : vector<8x96xf32>
    %382 = tpu.matmul %331, %19, %cst_72 {dimension_numbers = #tpu.dot_dimension_numbers<[1], [0], [0], [1], [0, 0, 1, 1], [], []>} : vector<8x32xf32>, vector<32x96xf32>, vector<8x96xf32> -> vector<8x96xf32>
    %383 = vector.broadcast %27 : vector<1x96xf32> to vector<8x96xf32>
    %384 = arith.addf %382, %383 : vector<8x96xf32>
    %cst_73 = arith.constant dense<0.000000e+00> : vector<8x96xf32>
    %385 = tpu.matmul %357, %20, %cst_73 {dimension_numbers = #tpu.dot_dimension_numbers<[1], [0], [0], [1], [0, 0, 1, 1], [], []>} : vector<8x32xf32>, vector<32x96xf32>, vector<8x96xf32> -> vector<8x96xf32>
    %386 = vector.extract_strided_slice %384 {offsets = [0, 0], sizes = [8, 64], strides = [1, 1]} : vector<8x96xf32> to vector<8x64xf32>
    %387 = vector.extract_strided_slice %385 {offsets = [0, 0], sizes = [8, 64], strides = [1, 1]} : vector<8x96xf32> to vector<8x64xf32>
    %388 = arith.addf %386, %387 : vector<8x64xf32>
    %389 = arith.negf %388 : vector<8x64xf32>
    %390 = math.exp %389 : vector<8x64xf32>
    %cst_74 = arith.constant 1.000000e+00 : f32
    %391 = vector.broadcast %cst_74 : f32 to vector<8x64xf32>
    %392 = arith.addf %391, %390 : vector<8x64xf32>
    %393 = arith.divf %391, %392 : vector<8x64xf32>
    %394 = vector.extract_strided_slice %393 {offsets = [0, 0], sizes = [8, 32], strides = [1, 1]} : vector<8x64xf32> to vector<8x32xf32>
    %395 = vector.extract_strided_slice %393 {offsets = [0, 32], sizes = [8, 32], strides = [1, 1]} : vector<8x64xf32> to vector<8x32xf32>
    %396 = vector.extract_strided_slice %384 {offsets = [0, 64], sizes = [8, 32], strides = [1, 1]} : vector<8x96xf32> to vector<8x32xf32>
    %397 = vector.extract_strided_slice %385 {offsets = [0, 64], sizes = [8, 32], strides = [1, 1]} : vector<8x96xf32> to vector<8x32xf32>
    %398 = vector.broadcast %28 : vector<1x32xf32> to vector<8x32xf32>
    %399 = arith.addf %397, %398 : vector<8x32xf32>
    %400 = arith.mulf %394, %399 : vector<8x32xf32>
    %401 = arith.addf %396, %400 : vector<8x32xf32>
    %402 = math.tanh %401 : vector<8x32xf32>
    %cst_75 = arith.constant 1.000000e+00 : f32
    %403 = vector.broadcast %cst_75 : f32 to vector<8x32xf32>
    %404 = arith.subf %403, %395 : vector<8x32xf32>
    %405 = arith.mulf %404, %402 : vector<8x32xf32>
    %406 = arith.mulf %395, %357 : vector<8x32xf32>
    %407 = arith.addf %405, %406 : vector<8x32xf32>
    %cst_76 = arith.constant dense<0.000000e+00> : vector<8x96xf32>
    %408 = tpu.matmul %381, %19, %cst_76 {dimension_numbers = #tpu.dot_dimension_numbers<[1], [0], [0], [1], [0, 0, 1, 1], [], []>} : vector<8x32xf32>, vector<32x96xf32>, vector<8x96xf32> -> vector<8x96xf32>
    %409 = vector.broadcast %27 : vector<1x96xf32> to vector<8x96xf32>
    %410 = arith.addf %408, %409 : vector<8x96xf32>
    %cst_77 = arith.constant dense<0.000000e+00> : vector<8x96xf32>
    %411 = tpu.matmul %407, %20, %cst_77 {dimension_numbers = #tpu.dot_dimension_numbers<[1], [0], [0], [1], [0, 0, 1, 1], [], []>} : vector<8x32xf32>, vector<32x96xf32>, vector<8x96xf32> -> vector<8x96xf32>
    %412 = vector.extract_strided_slice %410 {offsets = [0, 0], sizes = [8, 64], strides = [1, 1]} : vector<8x96xf32> to vector<8x64xf32>
    %413 = vector.extract_strided_slice %411 {offsets = [0, 0], sizes = [8, 64], strides = [1, 1]} : vector<8x96xf32> to vector<8x64xf32>
    %414 = arith.addf %412, %413 : vector<8x64xf32>
    %415 = arith.negf %414 : vector<8x64xf32>
    %416 = math.exp %415 : vector<8x64xf32>
    %cst_78 = arith.constant 1.000000e+00 : f32
    %417 = vector.broadcast %cst_78 : f32 to vector<8x64xf32>
    %418 = arith.addf %417, %416 : vector<8x64xf32>
    %419 = arith.divf %417, %418 : vector<8x64xf32>
    %420 = vector.extract_strided_slice %419 {offsets = [0, 0], sizes = [8, 32], strides = [1, 1]} : vector<8x64xf32> to vector<8x32xf32>
    %421 = vector.extract_strided_slice %419 {offsets = [0, 32], sizes = [8, 32], strides = [1, 1]} : vector<8x64xf32> to vector<8x32xf32>
    %422 = vector.extract_strided_slice %410 {offsets = [0, 64], sizes = [8, 32], strides = [1, 1]} : vector<8x96xf32> to vector<8x32xf32>
    %423 = vector.extract_strided_slice %411 {offsets = [0, 64], sizes = [8, 32], strides = [1, 1]} : vector<8x96xf32> to vector<8x32xf32>
    %424 = vector.broadcast %28 : vector<1x32xf32> to vector<8x32xf32>
    %425 = arith.addf %423, %424 : vector<8x32xf32>
    %426 = arith.mulf %420, %425 : vector<8x32xf32>
    %427 = arith.addf %422, %426 : vector<8x32xf32>
    %428 = math.tanh %427 : vector<8x32xf32>
    %cst_79 = arith.constant 1.000000e+00 : f32
    %429 = vector.broadcast %cst_79 : f32 to vector<8x32xf32>
    %430 = arith.subf %429, %421 : vector<8x32xf32>
    %431 = arith.mulf %430, %428 : vector<8x32xf32>
    %432 = arith.mulf %421, %407 : vector<8x32xf32>
    %433 = arith.addf %431, %432 : vector<8x32xf32>
    %434 = tpu.concatenate %107, %157, %207, %257, %307, %357, %407, %433 in 0 : vector<8x32xf32>, vector<8x32xf32>, vector<8x32xf32>, vector<8x32xf32>, vector<8x32xf32>, vector<8x32xf32>, vector<8x32xf32>, vector<8x32xf32> -> vector<64x32xf32>
    %c0_80 = arith.constant 0 : index
    %c0_81 = arith.constant 0 : index
    %435 = vector.load %arg8[%c0_80, %c0_81] : memref<32x128xf32, #tpu.memory_space<vmem>>, vector<32x128xf32>
    %cst_82 = arith.constant dense<0.000000e+00> : vector<64x128xf32>
    %436 = tpu.matmul %434, %435, %cst_82 {dimension_numbers = #tpu.dot_dimension_numbers<[1], [0], [0], [1], [0, 0, 1, 1], [], []>} : vector<64x32xf32>, vector<32x128xf32>, vector<64x128xf32> -> vector<64x128xf32>
    %c0_83 = arith.constant 0 : index
    %c0_84 = arith.constant 0 : index
    %437 = vector.load %arg9[%c0_83, %c0_84] : memref<1x128xf32, #tpu.memory_space<vmem>>, vector<1x128xf32>
    %438 = vector.broadcast %437 : vector<1x128xf32> to vector<64x128xf32>
    %439 = arith.addf %436, %438 : vector<64x128xf32>
    %cst_85 = arith.constant dense<0xFF800000> : vector<64xf32>
    %440 = vector.multi_reduction <maximumf>, %439, %cst_85 [1] : vector<64x128xf32> to vector<64xf32>
    %441 = vector.shape_cast %440 : vector<64xf32> to vector<64x1xf32>
    %442 = vector.broadcast %441 : vector<64x1xf32> to vector<64x128xf32>
    %443 = arith.subf %439, %442 : vector<64x128xf32>
    %444 = math.exp %443 : vector<64x128xf32>
    %cst_86 = arith.constant dense<0.000000e+00> : vector<64xf32>
    %445 = vector.multi_reduction <add>, %444, %cst_86 [1] : vector<64x128xf32> to vector<64xf32>
    %446 = vector.shape_cast %445 : vector<64xf32> to vector<64x1xf32>
    %447 = math.log %446 : vector<64x1xf32>
    %448 = vector.broadcast %447 : vector<64x1xf32> to vector<64x128xf32>
    %449 = arith.subf %443, %448 : vector<64x128xf32>
    %c0_87 = arith.constant 0 : index
    %c0_88 = arith.constant 0 : index
    %450 = vector.load %arg10[%c0_87, %c0_88] : memref<64x128xf32, #tpu.memory_space<vmem>>, vector<64x128xf32>
    tpu.vector_store %arg10[%c0_87, %c0_88], %449 {strides = array<i32>} : memref<64x128xf32, #tpu.memory_space<vmem>>, vector<64x128xf32>,
    return
  }
}

</mosaic_0001>

<bundles_post_ra>
// kernel: rnn_lm_forward.1
= control target key start
LH: loop header
LB: loop body
LE: loop exit
PB: predicated region body
PF: predicated region fallthrough
CT: control target
= control target key end

     0   :  { %v3569_v2 = vmov 0   ;;  %s4361_s0 = inlined_call_operand.vmem [shape: s32[64,1], index: 0, kind: input, shape index: {}]   ;;  %s4362_s1 = inlined_call_operand.vmem [shape: f32[128,32], index: 1, kind: input, shape index: {}]   ;;  %s4363_s2 = inlined_call_operand.vmem [shape: f32[32,96], index: 2, kind: input, shape index: {}]   ;;  %s4364_s3 = inlined_call_operand.vmem [shape: f32[32,96], index: 3, kind: input, shape index: {}]   ;;  %s4365_s4 = inlined_call_operand.vmem [shape: f32[2,96], index: 4, kind: input, shape index: {}]   ;;  %s4366_s5 = inlined_call_operand.vmem [shape: f32[32,96], index: 5, kind: input, shape index: {}]   ;;  %s4367_s6 = inlined_call_operand.vmem [shape: f32[32,96], index: 6, kind: input, shape index: {}]   ;;  %s4368_s7 = inlined_call_operand.vmem [shape: f32[2,96], index: 7, kind: input, shape index: {}]   ;;  %s4369_s8 = inlined_call_operand.vmem [shape: f32[32,128], index: 8, kind: input, shape index: {}]   ;;  %s4370_s9 = inlined_call_operand.vmem [shape: f32[1,128], index: 9, kind: input, shape index: {}]   ;;  %s4371_s10 = inlined_call_operand.hbm [shape: f32[64,128], index: 10, kind: output, shape index: {}]  }
   0x1   :  { %v38_v0 = vld [vmem:[%s4361_s0 + $0x10] sm:$0xff]  ;;  %v36_v1 = vld [vmem:[%s4361_s0] sm:$0xff]  ;;  %3406 = vset.pattern.permute.xlu1 %v3569_v2  ;;  %3405 = vset.pattern.permute.xlu0 %v3569_v2  ;;  %v109_v3 = vld [vmem:[%s4362_s1 + $0x78] sm:$0xff] }
   0x2   :  { %53 = vperm.xlu1 %3406, %v38_v0   ;;  %47 = vperm.xlu0 %3405, %v36_v1   ;;  %v39_v4 = vld [vmem:[%s4361_s0 + $0x18] sm:$0xff]  ;;  %v37_v5 = vld [vmem:[%s4361_s0 + $0x8] sm:$0xff]  ;;  %v108_v6 = vld [vmem:[%s4362_s1 + $0x70] sm:$0xff] }
   0x3   :  { %3040 = vmatprep.subr.mxu0 %v109_v3  ;;  %v107_v7 = vld [vmem:[%s4362_s1 + $0x68] sm:$0xff]  ;;  %v40_v9 = vld [vmem:[%s4361_s0 + $0x20] sm:$0xff] }
   0x4   :  { %3041 = vmatpush3.msra.mxu0 %v109_v3  ;;  %v41_v8 = vld [vmem:[%s4361_s0 + $0x28] sm:$0xff]  ;;  %v106_v10 = vld [vmem:[%s4362_s1 + $0x60] sm:$0xff] }
   0x5   :  { %3042 = vmatprep.subr.mxu0 %v108_v6 }
   0x6   :  { %56 = vperm.xlu1 %3406, %v39_v4   ;;  %50 = vperm.xlu0 %3405, %v37_v5  }
   0x7   :  { %3043 = vmatpush3.msra.mxu0 %v108_v6 }
   0x8   :  { %3044 = vmatprep.subr.mxu0 %v107_v7 }
   0x9   :  { %15 = vsyncpa [#allocation3], 0  ;;  %3045 = vmatpush3.msra.mxu0 %v107_v7  ;;  %v105_v11 = vld [vmem:[%s4362_s1 + $0x58] sm:$0xff]  ;;  %v42_v13 = vld [vmem:[%s4361_s0 + $0x30] sm:$0xff]  ;;  %v44_v27 = vlaneseq  ;;  %v3570_v31 = vmov 1.0   ;;  %v3571_v40 = vmov 0.0  }
   0xa   :  { %62 = vperm.xlu1 %3406, %v41_v8   ;;  %59 = vperm.xlu0 %3405, %v40_v9   ;;  %v43_v12 = vld [vmem:[%s4361_s0 + $0x38] sm:$0xff]  ;;  %v104_v14 = vld [vmem:[%s4362_s1 + $0x50] sm:$0xff]  ;;  %v103_v15 = vld [vmem:[%s4362_s1 + $0x48] sm:$0xff]  ;;  %vm244_vm8 = vcmask 261120   ;;  %vm3572_vm9 = vmmov 0   ;;  %s3574_s24 = smov 96  }
   0xb   :  { %3046 = vmatprep.subr.mxu0 %v106_v10  ;;  %v218_v16 = vld [vmem:[%s4363_s2 + $0x18] sm:$0xff]  ;;  %v102_v17 = vld [vmem:[%s4362_s1 + $0x40] sm:$0xff]  ;;  %v217_v18 = vld [vmem:[%s4363_s2 + $0x10] sm:$0xff]  ;;  %v3712_v28 = vand.u32 127, %v44_v27  ;;  %v241_v54 = vshrl.u32 %v44_v27, 7 }
   0xc   :  { %3047 = vmatpush3.msra.mxu0 %v106_v10  ;;  %3388 = vmatprep.subr.mxu1 %v218_v16  ;;  %v101_v19 = vld [vmem:[%s4362_s1 + $0x38] sm:$0xff]  ;;  %v100_v20 = vld [vmem:[%s4362_s1 + $0x30] sm:$0xff]  ;;  %v99_v21 = vld [vmem:[%s4362_s1 + $0x28] sm:$0xff] }
   0xd   :  { %3048 = vmatprep.subr.mxu0 %v105_v11  ;;  %3392 = vmatpush3.msra.mxu1 %v218_v16  ;;  %v98_v22 = vld [vmem:[%s4362_s1 + $0x20] sm:$0xff]  ;;  %v97_v23 = vld [vmem:[%s4362_s1 + $0x18] sm:$0xff]  ;;  %v96_v24 = vld [vmem:[%s4362_s1 + $0x10] sm:$0xff]  ;;  %vm225_vm10 = vcmp.lt.s32.totalorder %v3712_v28, 64  ;;  %v3791_v58 = vsub.s32 0, %v241_v54 }
   0xe   :  { %68 = vperm.xlu1 %3406, %v43_v12   ;;  %65 = vperm.xlu0 %3405, %v42_v13   ;;  %v95_v25 = vld [vmem:[%s4362_s1 + $0x8] sm:$0xff]  ;;  %v94_v26 = vld [vmem:[%s4362_s1] sm:$0xff]  ;;  %v3739_v47 = vld [vmem:[%s4364_s3 + $0x18] sm:$0xff] }
   0xf   :  { %3049 = vmatpush3.msra.mxu0 %v105_v11  ;;  %3389 = vmatprep.subr.mxu1 %v217_v18  ;;  %v216_v38 = vld [vmem:[%s4363_s2 + $0x8] sm:$0xff]  ;;  %v215_v39 = vld [vmem:[%s4363_s2] sm:$0xff]  ;;  %v3746_v49 = vld [vmem:[%s4364_s3 + $0x10] sm:$0xff] }
  0x10   :  { %3050 = vmatprep.subr.mxu0 %v104_v14  ;;  %3393 = vmatpush3.msra.mxu1 %v217_v18  ;;  %v3753_v51 = vld [vmem:[%s4364_s3 + $0x8] sm:$0xff]  ;;  %v3762_v52 = vld [vmem:[%s4364_s3] sm:$0xff] }
  0x11   :  { %3051 = vmatpush3.msra.mxu0 %v104_v14  ;;  %3390 = vmatprep.subr.mxu1 %v216_v38  ;;  %v224_v53 = vld [vmem:[%s4365_s4 + $0x1] sm:$0x1]  ;;  %v223_v55 = vld [vmem:[%s4365_s4] sm:$0x1]  ;;  %s3573_s4 = smov 64  }
  0x12   :  { %3052 = vmatprep.subr.mxu0 %v103_v15  ;;  %3394 = vmatpush3.msra.mxu1 %v216_v38  ;;  %v226_v56 = vsel %vm225_vm10, %v224_v53, 0.0  ;;  %v3812_v7 = vrot.slane %v224_v53, %v3791_v58 }
  0x13   :  { %3053 = vmatpush3.msra.mxu0 %v103_v15  ;;  %3391 = vmatprep.subr.mxu1 %v215_v39  ;;  %v227_v57 = vadd.f32 %v226_v56, %v223_v55 }
  0x14   :  { %3054 = vmatprep.subr.mxu0 %v102_v17  ;;  %3395 = vmatpush3.msra.mxu1 %v215_v39 }
  0x15   :  { %3055 = vmatpush3.msra.mxu0 %v102_v17  ;;  %3104 = vmatprep.subr.mxu1 %v3571_v40  ;;  %v3794_v59 = vrot.slane %v227_v57, %v3791_v58 }
  0x16   :  { %3056 = vmatprep.subr.mxu0 %v101_v19 }
  0x17   :  { %3057 = vmatpush3.msra.mxu0 %v101_v19 }
  0x18   :  { %3058 = vmatprep.subr.mxu0 %v100_v20 }
  0x19   :  { %3059 = vmatpush3.msra.mxu0 %v100_v20 }
  0x1a   :  { %3060 = vmatprep.subr.mxu0 %v99_v21 }
  0x1b   :  { %3061 = vmatpush3.msra.mxu0 %v99_v21 }
  0x1c   :  { %3062 = vmatprep.subr.mxu0 %v98_v22 }
  0x1d   :  { %3063 = vmatpush3.msra.mxu0 %v98_v22 }
  0x1e   :  { %3064 = vmatprep.subr.mxu0 %v97_v23 }
  0x1f   :  { %3065 = vmatpush3.msra.mxu0 %v97_v23  ;;  %v3824_v23 = vld [vmem:[%s4367_s6 + $0x18] sm:$0xff] }
  0x20   :  { %3066 = vmatprep.subr.mxu0 %v96_v24 }
  0x21   :  { %3067 = vmatpush3.msra.mxu0 %v96_v24  ;;  %v3829_v24 = vld [vmem:[%s4367_s6 + $0x10] sm:$0xff] }
  0x22   :  { %3068 = vmatprep.subr.mxu0 %v95_v25 }
  0x23   :  { %3069 = vmatpush3.msra.mxu0 %v95_v25  ;;  %v3836_v25 = vld [vmem:[%s4367_s6 + $0x8] sm:$0xff] }
  0x24   :  { %3070 = vmatprep.subr.mxu0 %v94_v26 }
  0x25   :  { %3071 = vmatpush3.msra.mxu0 %v94_v26  ;;  %v3843_v26 = vld [vmem:[%s4367_s6] sm:$0xff] }
  0x26   :  { %3084 = vmatprep.subr.mxu0 %v218_v16 }
  0x7d   :  { %v54_v29 = vpop.permute.xlu1 %53  ;;  %v48_v30 = vpop.permute.xlu0 %47 }
  0x7e   :  { %vm70_vm0 = vcmp.eq.s32.totalorder %v48_v30, %v3712_v28  ;;  %vm72_vm1 = vcmp.eq.s32.totalorder %v54_v29, %v3712_v28  ;;  %v3856_v29 = vld [vmem:[%s4366_s5 + $0x18] sm:$0xff]  ;;  %v3863_v30 = vld [vmem:[%s4366_s5 + $0x10] sm:$0xff] }
  0x7f   :  { %3072 = vmatprep.mubr.msk.f32.mxu0 %vm70_vm0, %v3570_v31 }
  0x81   :  { %v57_v32 = vpop.permute.xlu1 %56  ;;  %v51_v33 = vpop.permute.xlu0 %50 }
  0x82   :  { %vm71_vm2 = vcmp.eq.s32.totalorder %v51_v33, %v3712_v28  ;;  %vm73_vm3 = vcmp.eq.s32.totalorder %v57_v32, %v3712_v28  ;;  %v3876_v32 = vld [vmem:[%s4366_s5] sm:$0xff] }
  0x83   :  { %3073 = vmatmul.mubr.msk.f32.vlgmr.msra.gmra.mxu0 %vm71_vm2, %v3570_v31 }
  0x84   :  { %3075 = vmatprep.mubr.msk.f32.mxu0 %vm72_vm1, %v3570_v31  ;;  %3085 = vmatpush3.msra.mxu0 %v218_v16 }
  0x85   :  { %v63_v34 = vpop.permute.xlu1 %62  ;;  %v60_v35 = vpop.permute.xlu0 %59  ;;  %3086 = vmatprep.subr.mxu0 %v217_v18 }
  0x86   :  { %vm74_vm4 = vcmp.eq.s32.totalorder %v60_v35, %v3712_v28  ;;  %3087 = vmatpush3.msra.mxu0 %v217_v18  ;;  %vm75_vm5 = vcmp.eq.s32.totalorder %v63_v34, %v3712_v28 }
  0x87   :  { %3076 = vmatmul.mubr.msk.f32.gmra.mxu0 %vm73_vm3, %v3570_v31  ;;  %3088 = vmatprep.subr.mxu0 %v216_v38 }
  0x88   :  { %3078 = vmatprep.mubr.msk.f32.mxu0 %vm74_vm4, %v3570_v31  ;;  %3089 = vmatpush3.msra.mxu0 %v216_v38  ;;  %v237_v38 = vld [vmem:[%s4368_s7 + $0x1] sm:$0x1] }
  0x89   :  { %v66_v36 = vpop.permute.xlu0 %65  ;;  %v69_v37 = vpop.permute.xlu1 %68  ;;  %3090 = vmatprep.subr.mxu0 %v215_v39 }
  0x8a   :  { %vm76_vm6 = vcmp.eq.s32.totalorder %v66_v36, %v3712_v28  ;;  %vm77_vm7 = vcmp.eq.s32.totalorder %v69_v37, %v3712_v28  ;;  %3091 = vmatpush3.msra.mxu0 %v215_v39  ;;  %v3889_v39 = vrot.slane %v237_v38, %v3791_v58 }
  0x8b   :  { %3079 = vmatmul.mubr.msk.f32.gmra.mxu0 %vm75_vm5, %v3570_v31  ;;  %3137 = vmatprep.subr.mxu0 %v3571_v40 }
  0x8c   :  { %3081 = vmatprep.mubr.msk.f32.mxu0 %vm76_vm6, %v3570_v31 }
  0x8f   :  { %3082 = vmatmul.mubr.msk.f32.gmra.mxu0 %vm77_vm7, %v3570_v31  ;;  %v3869_v31 = vld [vmem:[%s4366_s5 + $0x8] sm:$0xff] }
 0x143   :  { %v3074_v41 = vpop.f32.mrf.mxu0 }
 0x145   :  { %v176_v42 = vpop.f32.mrf.mxu0 }
 0x146   :  { %3092 = vmatprep.mubr.msk.f32.mxu0 %vm244_vm8, %v176_v42 }
 0x147   :  { %v3077_v43 = vpop.f32.mrf.mxu0  ;;  %3093 = vmatmul.mubr.msk.f32.vlgmr.msra.gmra.mxu0 %vm244_vm8, %v3074_v41 }
 0x148   :  { %3138 = vmatpush3.msra.mxu0 %v3824_v23 }
 0x149   :  { %v186_v44 = vpop.f32.mrf.mxu0  ;;  %3139 = vmatprep.subr.mxu0 %v3571_v40 }
 0x14a   :  { %3095 = vmatprep.mubr.msk.f32.mxu0 %vm244_vm8, %v186_v44  ;;  %3140 = vmatpush3.msra.mxu0 %v3829_v24 }
 0x14b   :  { %v3080_v45 = vpop.f32.mrf.mxu0  ;;  %3096 = vmatmul.mubr.msk.f32.gmra.mxu0 %vm244_vm8, %v3077_v43  ;;  %3141 = vmatprep.subr.mxu0 %v3571_v40 }
 0x14c   :  { %3145 = vmatprep.mubr.msk.f32.mxu0 %vm3572_vm9, %v3571_v40  ;;  %3142 = vmatpush3.msra.mxu0 %v3836_v25 }
 0x14d   :  { %v196_v46 = vpop.f32.mrf.mxu0  ;;  %3143 = vmatprep.subr.mxu0 %v3571_v40 }
 0x14e   :  { %3098 = vmatprep.mubr.msk.f32.mxu1 %vm244_vm8, %v196_v46  ;;  %3144 = vmatpush3.msra.mxu0 %v3843_v26  ;;  %v236_v46 = vld [vmem:[%s4368_s7] sm:$0x1] }
 0x14f   :  { %v3083_v48 = vpop.f32.mrf.mxu0  ;;  %3099 = vmatmul.mubr.msk.f32.vlgmr.msra.gmra.mxu1 %vm244_vm8, %v3080_v45  ;;  %3146 = vmatmul.mubr.f32.vlgmr.msra.gmra.mxu0 %v3571_v40 }
 0x150   :  { %3105 = vmatpush3.msra.mxu1 %v3739_v47  ;;  %3159 = vmatprep.subr.mxu0 %v3571_v40 }
 0x151   :  { %3106 = vmatprep.subr.mxu1 %v3571_v40  ;;  %v206_v50 = vpop.f32.mrf.mxu0  ;;  %3167 = vmatprep.mubr.msk.f32.mxu0 %vm3572_vm9, %v3571_v40 }
 0x152   :  { %3107 = vmatpush3.msra.mxu1 %v3746_v49  ;;  %3101 = vmatprep.mubr.msk.f32.mxu1 %vm244_vm8, %v206_v50 }
 0x153   :  { %3108 = vmatprep.subr.mxu1 %v3571_v40  ;;  %3102 = vmatmul.mubr.msk.f32.gmra.mxu1 %vm244_vm8, %v3083_v48  ;;  %v238_v48 = vsel %vm225_vm10, %v237_v38, 0.0 }
 0x154   :  { %3109 = vmatpush3.msra.mxu1 %v3753_v51  ;;  %3112 = vmatprep.mubr.msk.f32.mxu1 %vm3572_vm9, %v3571_v40  ;;  %v239_v54 = vadd.f32 %v238_v48, %v236_v46 }
 0x155   :  { %3110 = vmatprep.subr.mxu1 %v3571_v40  ;;  %3160 = vmatpush3.msra.mxu0 %v3856_v29 }
 0x156   :  { %3111 = vmatpush3.msra.mxu1 %v3762_v52  ;;  %3161 = vmatprep.subr.mxu0 %v3571_v40  ;;  %v3925_v56 = vrot.slane %v239_v54, %v3791_v58 }
 0x157   :  { %3113 = vmatmul.mubr.f32.vlgmr.msra.gmra.mxu1 %v3571_v40  ;;  %3115 = vmatprep.subr.mxu1 %v3571_v40 }
 0x158   :  { %3116 = vmatpush3.msra.mxu1 %v3739_v47  ;;  %3123 = vmatprep.mubr.msk.f32.mxu1 %vm3572_vm9, %v3571_v40 }
 0x159   :  { %3117 = vmatprep.subr.mxu1 %v3571_v40  ;;  %3162 = vmatpush3.msra.mxu0 %v3863_v30 }
 0x15a   :  { %3118 = vmatpush3.msra.mxu1 %v3746_v49  ;;  %3163 = vmatprep.subr.mxu0 %v3571_v40 }
 0x15b   :  { %3119 = vmatprep.subr.mxu1 %v3571_v40  ;;  %3164 = vmatpush3.msra.mxu0 %v3869_v31 }
 0x15c   :  { %3120 = vmatpush3.msra.mxu1 %v3753_v51  ;;  %3165 = vmatprep.subr.mxu0 %v3571_v40 }
 0x15d   :  { %3121 = vmatprep.subr.mxu1 %v3571_v40  ;;  %3166 = vmatpush3.msra.mxu0 %v3876_v32 }
 0x15e   :  { %3122 = vmatpush3.msra.mxu1 %v3762_v52  ;;  %3181 = vmatprep.subr.mxu0 %v3571_v40 }
 0x15f   :  { %3126 = vmatprep.subr.mxu1 %v3571_v40 }
 0x207   :  { %v3094_v60 = vpop.f32.mrf.mxu0 }
 0x208   :  { %v3797_v61 = vadd.f32 %v3094_v60, %v3794_v59 }
 0x209   :  { %v335_v62 = vpop.f32.mrf.mxu0 }
 0x20a   :  { %v336_v13 = vadd.f32 %v335_v62, %v3794_v59 }
 0x20b   :  { %v3097_v63 = vpop.f32.mrf.mxu0 }
 0x20c   :  { %v3800_v0 = vadd.f32 %v3097_v63, %v3794_v59 }
 0x20d   :  { %v3891_v41 = vpop.f32.mrf.mxu0 }
 0x20f   :  { %v3100_v1 = vpop.f32.mrf.mxu1  ;;  %v720_v42 = vpop.f32.mrf.mxu0 }
 0x210   :  { %v3803_v2 = vadd.f32 %v3100_v1, %v3794_v59  ;;  %v735_v43 = vadd.f32 %v3889_v39, %v720_v42 }
 0x211   :  { %v355_v3 = vpop.f32.mrf.mxu1  ;;  %v3147_v44 = vpop.f32.mrf.mxu0 }
 0x212   :  { %v3806_v4 = vadd.f32 %v355_v3, %v3794_v59 }
 0x213   :  { %v3103_v5 = vpop.f32.mrf.mxu1 }
 0x214   :  { %v3809_v6 = vadd.f32 %v3103_v5, %v3794_v59 }
 0x215   :  { %v365_v8 = vpop.f32.mrf.mxu1 }
 0x216   :  { %v3815_v9 = vadd.f32 %v365_v8, %v3794_v59 }
 0x217   :  { %v443_v10 = vpop.f32.mrf.mxu1 }
 0x218   :  { %v458_v11 = vadd.f32 %v3812_v7, %v443_v10  ;;  %v447_v14 = vadd.f32 %v443_v10, %v336_v13 }
 0x219   :  { %v3114_v12 = vpop.f32.mrf.mxu1 }
 0x21a   :  { %460 = vrot.lane.b32.xlu0 %v458_v11, %s3573_s4  ;;  %v2825_v15 = vmul.f32 -1.442695, %v447_v14 }
 0x21c   :  { %3407 = vpow2.f32 %v2825_v15 }
 0x229   :  { %v3408_v16 = vpop.eup %3407 }
 0x22a   :  { %v451_v17 = vadd.f32 1.0, %v3408_v16 }
 0x22c   :  { %3409 = vrcp.f32 %v451_v17 }
 0x239   :  { %v3410_v18 = vpop.eup %3409 }
 0x23a   :  { %v470_v33 = vsub.f32 1.0, %v3410_v18  ;;  %v476_v35 = vmul.f32 0.0, %v3410_v18 }
 0x28c   :  { %v461_v19 = vpop.permute.xlu0 %460 }
 0x28d   :  { %v463_v20 = vmul.f32 %v3410_v18, %v461_v19 }
 0x28f   :  { %465 = vrot.lane.b32.xlu1 %v463_v20, %s3573_s4 }
 0x301   :  { %v466_v21 = vpop.permute.xlu1 %465 }
 0x302   :  { %v468_v22 = vadd.f32 %v466_v21, %v336_v13 }
 0x304   :  { %3411 = vtanh.f32 %v468_v22 }
 0x311   :  { %v3412_v27 = vpop.eup %3411 }
 0x312   :  { %472 = vrot.lane.b32.xlu0 %v3412_v27, %s3574_s24 }
 0x384   :  { %v473_v34 = vpop.permute.xlu0 %472 }
 0x385   :  { %v475_v36 = vmul.f32 %v473_v34, %v470_v33 }
 0x387   :  { %v3881_v37 = vadd.f32 %v476_v35, %v475_v36 }
 0x389   :  { %479 = vrot.lane.b32.xlu1 %v3881_v37, %s3574_s24 }
 0x38d   :  { %737 = vrot.lane.b32.xlu1 %v735_v43, %s3573_s4 }
 0x3fb   :  { %v480_v45 = vpop.permute.xlu1 %479 }
 0x3fc   :  { %3124 = vmatmul.mubr.msk.f32.vlgmr.msra.gmra.mxu1 %vm244_vm8, %v480_v45 }
 0x3fd   :  { %3127 = vmatpush3.msra.mxu1 %v3856_v29  ;;  %3134 = vmatprep.mubr.msk.f32.mxu1 %vm3572_vm9, %v3571_v40 }
 0x3fe   :  { %3128 = vmatprep.subr.mxu1 %v3571_v40 }
 0x3ff   :  { %3129 = vmatpush3.msra.mxu1 %v3863_v30  ;;  %v738_v5 = vpop.permute.xlu1 %737 }
 0x400   :  { %3130 = vmatprep.subr.mxu1 %v3571_v40 }
 0x401   :  { %3131 = vmatpush3.msra.mxu1 %v3869_v31 }
 0x402   :  { %3132 = vmatprep.subr.mxu1 %v3571_v40 }
 0x403   :  { %3133 = vmatpush3.msra.mxu1 %v3876_v32 }
 0x404   :  { %3135 = vmatmul.mubr.msk.f32.vlgmr.msra.gmra.mxu1 %vm244_vm8, %v480_v45  ;;  %3148 = vmatprep.subr.mxu1 %v3571_v40 }
 0x405   :  { %3149 = vmatpush3.msra.mxu1 %v3739_v47  ;;  %3156 = vmatprep.mubr.msk.f32.mxu1 %vm3572_vm9, %v3571_v40 }
 0x406   :  { %3150 = vmatprep.subr.mxu1 %v3571_v40 }
 0x407   :  { %3151 = vmatpush3.msra.mxu1 %v3746_v49 }
 0x408   :  { %3152 = vmatprep.subr.mxu1 %v3571_v40 }
 0x409   :  { %3153 = vmatpush3.msra.mxu1 %v3753_v51 }
 0x40a   :  { %3154 = vmatprep.subr.mxu1 %v3571_v40 }
 0x40b   :  { %3155 = vmatpush3.msra.mxu1 %v3762_v52 }
 0x40c   :  { %3170 = vmatprep.subr.mxu1 %v3571_v40 }
 0x4bc   :  { %v549_v50 = vpop.f32.mrf.mxu1 }
 0x4bd   :  { %v560_v53 = vadd.f32 %v549_v50, %v3812_v7  ;;  %v553_v11 = vadd.f32 %v549_v50, %v3797_v61 }
 0x4be   :  { %v3125_v55 = vpop.f32.mrf.mxu1 }
 0x4bf   :  { %562 = vrot.lane.b32.xlu0 %v560_v53, %s3573_s4  ;;  %v2827_v12 = vmul.f32 -1.442695, %v553_v11 }
 0x4c4   :  { %v650_v57 = vpop.f32.mrf.mxu1 }
 0x4c5   :  { %v651_v60 = vadd.f32 %v650_v57, %v3925_v56 }
 0x4c6   :  { %v3136_v62 = vpop.f32.mrf.mxu1 }
 0x4c7   :  { %v724_v63 = vadd.f32 %v720_v42, %v651_v60  ;;  %v346_v62 = vadd.f32 %v3891_v41, %v3794_v59 }
 0x4c9   :  { %v2829_v1 = vmul.f32 -1.442695, %v724_v63 }
 0x4cb   :  { %3413 = vpow2.f32 %v2829_v1 }
 0x4d8   :  { %v3414_v3 = vpop.eup %3413 }
 0x4d9   :  { %v728_v28 = vadd.f32 1.0, %v3414_v3 }
 0x4db   :  { %3415 = vrcp.f32 %v728_v28 }
 0x4dc   :  { %3417 = vpow2.f32 %v2827_v12 }
 0x4e8   :  { %v3416_v8 = vpop.eup %3415 }
 0x4e9   :  { %v740_v10 = vmul.f32 %v3416_v8, %v738_v5  ;;  %v3418_v58 = vpop.eup %3417  ;;  %v747_v27 = vsub.f32 1.0, %v3416_v8  ;;  %v753_v34 = vmul.f32 0.0, %v3416_v8 }
 0x4ea   :  { %v557_v13 = vadd.f32 1.0, %v3418_v58 }
 0x4eb   :  { %742 = vrot.lane.b32.xlu1 %v740_v10, %s3573_s4 }
 0x4ec   :  { %3419 = vrcp.f32 %v557_v13 }
 0x4f9   :  { %v3420_v14 = vpop.eup %3419 }
 0x4fa   :  { %v572_v38 = vsub.f32 1.0, %v3420_v14  ;;  %v578_v43 = vmul.f32 %v3420_v14, %v3881_v37 }
 0x531   :  { %v563_v15 = vpop.permute.xlu0 %562 }
 0x532   :  { %v565_v16 = vmul.f32 %v3420_v14, %v563_v15 }
 0x534   :  { %567 = vrot.lane.b32.xlu0 %v565_v16, %s3573_s4 }
 0x55d   :  { %v743_v17 = vpop.permute.xlu1 %742 }
 0x55e   :  { %v745_v18 = vadd.f32 %v743_v17, %v651_v60 }
 0x560   :  { %3421 = vtanh.f32 %v745_v18 }
 0x56d   :  { %v3422_v19 = vpop.eup %3421 }
 0x56e   :  { %749 = vrot.lane.b32.xlu1 %v3422_v19, %s3574_s24 }
 0x5a6   :  { %v568_v20 = vpop.permute.xlu0 %567 }
 0x5a7   :  { %v570_v21 = vadd.f32 %v568_v20, %v3797_v61 }
 0x5a9   :  { %3423 = vtanh.f32 %v570_v21 }
 0x5b6   :  { %v3424_v22 = vpop.eup %3423 }
 0x5b7   :  { %574 = vrot.lane.b32.xlu0 %v3424_v22, %s3574_s24 }
 0x5e0   :  { %v750_v33 = vpop.permute.xlu1 %749 }
 0x5e1   :  { %v752_v35 = vmul.f32 %v750_v33, %v747_v27 }
 0x5e3   :  { %v3934_v36 = vadd.f32 %v753_v34, %v752_v35 }
 0x5e5   :  { %928 = vrot.lane.b32.xlu1 %v3934_v36, %s3574_s24 }
 0x629   :  { %v575_v42 = vpop.permute.xlu0 %574 }
 0x62a   :  { %v577_v44 = vmul.f32 %v575_v42, %v572_v38 }
 0x62c   :  { %v3939_v45 = vadd.f32 %v578_v43, %v577_v44 }
 0x62e   :  { %756 = vrot.lane.b32.xlu0 %v3939_v45, %s3574_s24 }
 0x657   :  { %v3958_v37 = vpop.permute.xlu1 %928 }
 0x6a0   :  { %v757_v61 = vpop.permute.xlu0 %756 }
 0x6a1   :  { %3157 = vmatmul.mubr.msk.f32.vlgmr.msra.gmra.mxu1 %vm244_vm8, %v757_v61  ;;  %3168 = vmatmul.mubr.msk.f32.vlgmr.msra.gmra.mxu0 %vm244_vm8, %v757_v61 }
 0x6a2   :  { %3171 = vmatpush3.msra.mxu1 %v3824_v23  ;;  %3178 = vmatprep.mubr.msk.f32.mxu1 %vm3572_vm9, %v3571_v40 }
 0x6a3   :  { %3172 = vmatprep.subr.mxu1 %v3571_v40  ;;  %3182 = vmatpush3.msra.mxu0 %v3739_v47 }
 0x6a4   :  { %3173 = vmatpush3.msra.mxu1 %v3829_v24  ;;  %3183 = vmatprep.subr.mxu0 %v3571_v40 }
 0x6a5   :  { %3174 = vmatprep.subr.mxu1 %v3571_v40  ;;  %3184 = vmatpush3.msra.mxu0 %v3746_v49 }
 0x6a6   :  { %3175 = vmatpush3.msra.mxu1 %v3836_v25  ;;  %3185 = vmatprep.subr.mxu0 %v3571_v40 }
 0x6a7   :  { %3176 = vmatprep.subr.mxu1 %v3571_v40  ;;  %3186 = vmatpush3.msra.mxu0 %v3753_v51 }
 0x6a8   :  { %3177 = vmatpush3.msra.mxu1 %v3843_v26  ;;  %3187 = vmatprep.subr.mxu0 %v3571_v40 }
 0x6a9   :  { %3179 = vmatmul.mubr.msk.f32.vlgmr.msra.gmra.mxu1 %vm244_vm8, %v3958_v37  ;;  %3192 = vmatprep.subr.mxu1 %v3571_v40 }
 0x6aa   :  { %3193 = vmatpush3.msra.mxu1 %v3856_v29  ;;  %3188 = vmatpush3.msra.mxu0 %v3762_v52 }
 0x6ab   :  { %3194 = vmatprep.subr.mxu1 %v3571_v40  ;;  %3189 = vmatprep.mubr.msk.f32.mxu0 %vm3572_vm9, %v3571_v40 }
 0x6ac   :  { %3195 = vmatpush3.msra.mxu1 %v3863_v30  ;;  %3203 = vmatprep.subr.mxu0 %v3571_v40 }
 0x6ad   :  { %3196 = vmatprep.subr.mxu1 %v3571_v40  ;;  %3200 = vmatprep.mubr.msk.f32.mxu1 %vm3572_vm9, %v3571_v40 }
 0x6ae   :  { %3197 = vmatpush3.msra.mxu1 %v3869_v31 }
 0x6af   :  { %3198 = vmatprep.subr.mxu1 %v3571_v40 }
 0x6b0   :  { %3199 = vmatpush3.msra.mxu1 %v3876_v32 }
 0x6b1   :  { %3214 = vmatprep.subr.mxu1 %v3571_v40 }
 0x761   :  { %v826_v46 = vpop.f32.mrf.mxu1  ;;  %v923_v48 = vpop.f32.mrf.mxu0 }
 0x762   :  { %v837_v50 = vadd.f32 %v826_v46, %v3812_v7  ;;  %v830_v63 = vadd.f32 %v826_v46, %v346_v62  ;;  %v924_v3 = vadd.f32 %v923_v48, %v3925_v56 }
 0x763   :  { %v3158_v53 = vpop.f32.mrf.mxu1  ;;  %v3169_v54 = vpop.f32.mrf.mxu0 }
 0x764   :  { %839 = vrot.lane.b32.xlu0 %v837_v50, %s3573_s4  ;;  %v2831_v1 = vmul.f32 -1.442695, %v830_v63 }
 0x766   :  { %3425 = vpow2.f32 %v2831_v1 }
 0x769   :  { %v998_v55 = vpop.f32.mrf.mxu1 }
 0x76a   :  { %v1009_v57 = vadd.f32 %v998_v55, %v3889_v39  ;;  %v1002_v28 = vadd.f32 %v998_v55, %v924_v3 }
 0x76b   :  { %v3180_v60 = vpop.f32.mrf.mxu1 }
 0x76c   :  { %1011 = vrot.lane.b32.xlu1 %v1009_v57, %s3573_s4  ;;  %v2834_v5 = vmul.f32 -1.442695, %v1002_v28 }
 0x76e   :  { %3427 = vpow2.f32 %v2834_v5 }
 0x773   :  { %v3426_v8 = vpop.eup %3425 }
 0x774   :  { %v834_v10 = vadd.f32 1.0, %v3426_v8 }
 0x776   :  { %3429 = vrcp.f32 %v834_v10 }
 0x77b   :  { %v3428_v11 = vpop.eup %3427 }
 0x77c   :  { %v1006_v12 = vadd.f32 1.0, %v3428_v11 }
 0x77e   :  { %3431 = vrcp.f32 %v1006_v12 }
 0x783   :  { %v3430_v58 = vpop.eup %3429 }
 0x784   :  { %v849_v22 = vsub.f32 1.0, %v3430_v58  ;;  %v855_v33 = vmul.f32 %v3430_v58, %v3939_v45 }
 0x78b   :  { %v3432_v59 = vpop.eup %3431 }
 0x78c   :  { %v1021_v38 = vsub.f32 1.0, %v3432_v59  ;;  %v1027_v43 = vmul.f32 %v3432_v59, %v3934_v36 }
 0x7d6   :  { %v840_v13 = vpop.permute.xlu0 %839 }
 0x7d7   :  { %v842_v14 = vmul.f32 %v3430_v58, %v840_v13 }
 0x7d9   :  { %844 = vrot.lane.b32.xlu0 %v842_v14, %s3573_s4 }
 0x7de   :  { %v1012_v41 = vpop.permute.xlu1 %1011 }
 0x7df   :  { %v1014_v15 = vmul.f32 %v3432_v59, %v1012_v41 }
 0x7e1   :  { %1016 = vrot.lane.b32.xlu1 %v1014_v15, %s3573_s4 }
 0x84b   :  { %v845_v16 = vpop.permute.xlu0 %844 }
 0x84c   :  { %v847_v17 = vadd.f32 %v845_v16, %v346_v62 }
 0x84e   :  { %3433 = vtanh.f32 %v847_v17 }
 0x853   :  { %v1017_v18 = vpop.permute.xlu1 %1016 }
 0x854   :  { %v1019_v19 = vadd.f32 %v1017_v18, %v924_v3 }
 0x856   :  { %3435 = vtanh.f32 %v1019_v19 }
 0x85b   :  { %v3434_v20 = vpop.eup %3433 }
 0x85c   :  { %851 = vrot.lane.b32.xlu0 %v3434_v20, %s3574_s24 }
 0x863   :  { %v3436_v21 = vpop.eup %3435 }
 0x864   :  { %1023 = vrot.lane.b32.xlu1 %v3436_v21, %s3574_s24 }
 0x8ce   :  { %v852_v27 = vpop.permute.xlu0 %851 }
 0x8cf   :  { %v854_v34 = vmul.f32 %v852_v27, %v849_v22 }
 0x8d1   :  { %v3991_v35 = vadd.f32 %v855_v33, %v854_v34 }
 0x8d3   :  { %1030 = vrot.lane.b32.xlu0 %v3991_v35, %s3574_s24 }
 0x8d6   :  { %v1024_v42 = vpop.permute.xlu1 %1023 }
 0x8d7   :  { %v1026_v44 = vmul.f32 %v1024_v42, %v1021_v38 }
 0x8d9   :  { %v3996_v61 = vadd.f32 %v1027_v43, %v1026_v44 }
 0x8db   :  { %1202 = vrot.lane.b32.xlu1 %v3996_v61, %s3574_s24 }
 0x945   :  { %v1031_v46 = vpop.permute.xlu0 %1030 }
 0x946   :  { %3190 = vmatmul.mubr.msk.f32.vlgmr.msra.gmra.mxu0 %vm244_vm8, %v1031_v46  ;;  %3201 = vmatmul.mubr.msk.f32.vlgmr.msra.gmra.mxu1 %vm244_vm8, %v1031_v46 }
 0x947   :  { %3204 = vmatpush3.msra.mxu0 %v3824_v23  ;;  %3211 = vmatprep.mubr.msk.f32.mxu0 %vm3572_vm9, %v3571_v40 }
 0x948   :  { %3205 = vmatprep.subr.mxu0 %v3571_v40  ;;  %3215 = vmatpush3.msra.mxu1 %v3739_v47 }
 0x949   :  { %3206 = vmatpush3.msra.mxu0 %v3829_v24  ;;  %3216 = vmatprep.subr.mxu1 %v3571_v40 }
 0x94a   :  { %3207 = vmatprep.subr.mxu0 %v3571_v40  ;;  %3217 = vmatpush3.msra.mxu1 %v3746_v49 }
 0x94b   :  { %3208 = vmatpush3.msra.mxu0 %v3836_v25  ;;  %3218 = vmatprep.subr.mxu1 %v3571_v40 }
 0x94c   :  { %3209 = vmatprep.subr.mxu0 %v3571_v40  ;;  %3219 = vmatpush3.msra.mxu1 %v3753_v51 }
 0x94d   :  { %3210 = vmatpush3.msra.mxu0 %v3843_v26  ;;  %v4016_v36 = vpop.permute.xlu1 %1202  ;;  %3220 = vmatprep.subr.mxu1 %v3571_v40 }
 0x94e   :  { %3212 = vmatmul.mubr.msk.f32.vlgmr.msra.gmra.mxu0 %vm244_vm8, %v4016_v36  ;;  %3225 = vmatprep.subr.mxu0 %v3571_v40 }
 0x94f   :  { %3226 = vmatpush3.msra.mxu0 %v3856_v29  ;;  %3221 = vmatpush3.msra.mxu1 %v3762_v52 }
 0x950   :  { %3227 = vmatprep.subr.mxu0 %v3571_v40  ;;  %3222 = vmatprep.mubr.msk.f32.mxu1 %vm3572_vm9, %v3571_v40 }
 0x951   :  { %3228 = vmatpush3.msra.mxu0 %v3863_v30  ;;  %3233 = vmatprep.mubr.msk.f32.mxu0 %vm3572_vm9, %v3571_v40 }
 0x952   :  { %3229 = vmatprep.subr.mxu0 %v3571_v40  ;;  %3236 = vmatprep.subr.mxu1 %v3571_v40 }
 0x953   :  { %3230 = vmatpush3.msra.mxu0 %v3869_v31 }
 0x954   :  { %3231 = vmatprep.subr.mxu0 %v3571_v40 }
 0x955   :  { %3232 = vmatpush3.msra.mxu0 %v3876_v32 }
 0x956   :  { %3247 = vmatprep.subr.mxu0 %v3571_v40 }
 0xa06   :  { %v1100_v45 = vpop.f32.mrf.mxu0  ;;  %v1197_v48 = vpop.f32.mrf.mxu1 }
 0xa07   :  { %v1111_v50 = vadd.f32 %v1100_v45, %v3812_v7  ;;  %v1104_v62 = vadd.f32 %v1100_v45, %v3800_v0  ;;  %v1198_v1 = vadd.f32 %v1197_v48, %v3925_v56 }
 0xa08   :  { %v3191_v53 = vpop.f32.mrf.mxu0  ;;  %v3202_v54 = vpop.f32.mrf.mxu1 }
 0xa09   :  { %1113 = vrot.lane.b32.xlu0 %v1111_v50, %s3573_s4  ;;  %v2836_v63 = vmul.f32 -1.442695, %v1104_v62 }
 0xa0b   :  { %3437 = vpow2.f32 %v2836_v63 }
 0xa0e   :  { %v1272_v55 = vpop.f32.mrf.mxu0 }
 0xa0f   :  { %v1283_v57 = vadd.f32 %v1272_v55, %v3889_v39  ;;  %v1276_v3 = vadd.f32 %v1272_v55, %v1198_v1 }
 0xa10   :  { %v3213_v60 = vpop.f32.mrf.mxu0 }
 0xa11   :  { %1285 = vrot.lane.b32.xlu1 %v1283_v57, %s3573_s4  ;;  %v2839_v28 = vmul.f32 -1.442695, %v1276_v3 }
 0xa13   :  { %3439 = vpow2.f32 %v2839_v28 }
 0xa18   :  { %v3438_v5 = vpop.eup %3437 }
 0xa19   :  { %v1108_v8 = vadd.f32 1.0, %v3438_v5 }
 0xa1b   :  { %3441 = vrcp.f32 %v1108_v8 }
 0xa20   :  { %v3440_v10 = vpop.eup %3439 }
 0xa21   :  { %v1280_v11 = vadd.f32 1.0, %v3440_v10 }
 0xa23   :  { %3443 = vrcp.f32 %v1280_v11 }
 0xa28   :  { %v3442_v12 = vpop.eup %3441 }
 0xa29   :  { %v1123_v21 = vsub.f32 1.0, %v3442_v12  ;;  %v1129_v27 = vmul.f32 %v3442_v12, %v3991_v35 }
 0xa30   :  { %v3444_v14 = vpop.eup %3443 }
 0xa31   :  { %v1301_v42 = vmul.f32 %v3444_v14, %v3996_v61 }
 0xa7b   :  { %v1114_v58 = vpop.permute.xlu0 %1113 }
 0xa7c   :  { %v1116_v13 = vmul.f32 %v3442_v12, %v1114_v58 }
 0xa7e   :  { %1118 = vrot.lane.b32.xlu0 %v1116_v13, %s3573_s4 }
 0xa83   :  { %v1286_v59 = vpop.permute.xlu1 %1285 }
 0xa84   :  { %v1288_v41 = vmul.f32 %v3444_v14, %v1286_v59 }
 0xa86   :  { %1290 = vrot.lane.b32.xlu1 %v1288_v41, %s3573_s4 }
 0xaf0   :  { %v1119_v15 = vpop.permute.xlu0 %1118 }
 0xaf1   :  { %v1121_v16 = vadd.f32 %v1119_v15, %v3800_v0  ;;  %v1295_v0 = vsub.f32 1.0, %v3444_v14 }
 0xaf3   :  { %3445 = vtanh.f32 %v1121_v16 }
 0xaf8   :  { %v1291_v17 = vpop.permute.xlu1 %1290 }
 0xaf9   :  { %v1293_v18 = vadd.f32 %v1291_v17, %v1198_v1 }
 0xafb   :  { %3447 = vtanh.f32 %v1293_v18 }
 0xb00   :  { %v3446_v19 = vpop.eup %3445 }
 0xb01   :  { %1125 = vrot.lane.b32.xlu0 %v3446_v19, %s3574_s24 }
 0xb08   :  { %v3448_v20 = vpop.eup %3447 }
 0xb09   :  { %1297 = vrot.lane.b32.xlu1 %v3448_v20, %s3574_s24 }
 0xb73   :  { %v1126_v22 = vpop.permute.xlu0 %1125 }
 0xb74   :  { %v1128_v33 = vmul.f32 %v1126_v22, %v1123_v21 }
 0xb76   :  { %v4048_v34 = vadd.f32 %v1129_v27, %v1128_v33 }
 0xb78   :  { %1304 = vrot.lane.b32.xlu0 %v4048_v34, %s3574_s24 }
 0xb7b   :  { %v1298_v38 = vpop.permute.xlu1 %1297 }
 0xb7c   :  { %v1300_v43 = vmul.f32 %v1298_v38, %v1295_v0 }
 0xb7e   :  { %v4053_v44 = vadd.f32 %v1301_v42, %v1300_v43 }
 0xb80   :  { %1476 = vrot.lane.b32.xlu1 %v4053_v44, %s3574_s24 }
 0xbea   :  { %v1305_v46 = vpop.permute.xlu0 %1304 }
 0xbeb   :  { %3223 = vmatmul.mubr.msk.f32.vlgmr.msra.gmra.mxu1 %vm244_vm8, %v1305_v46  ;;  %3234 = vmatmul.mubr.msk.f32.vlgmr.msra.gmra.mxu0 %vm244_vm8, %v1305_v46 }
 0xbec   :  { %3237 = vmatpush3.msra.mxu1 %v3824_v23  ;;  %3244 = vmatprep.mubr.msk.f32.mxu1 %vm3572_vm9, %v3571_v40 }
 0xbed   :  { %3238 = vmatprep.subr.mxu1 %v3571_v40  ;;  %3248 = vmatpush3.msra.mxu0 %v3739_v47 }
 0xbee   :  { %3239 = vmatpush3.msra.mxu1 %v3829_v24  ;;  %3249 = vmatprep.subr.mxu0 %v3571_v40 }
 0xbef   :  { %3240 = vmatprep.subr.mxu1 %v3571_v40  ;;  %3250 = vmatpush3.msra.mxu0 %v3746_v49 }
 0xbf0   :  { %3241 = vmatpush3.msra.mxu1 %v3836_v25  ;;  %3251 = vmatprep.subr.mxu0 %v3571_v40 }
 0xbf1   :  { %3242 = vmatprep.subr.mxu1 %v3571_v40  ;;  %3252 = vmatpush3.msra.mxu0 %v3753_v51 }
 0xbf2   :  { %3243 = vmatpush3.msra.mxu1 %v3843_v26  ;;  %v4073_v35 = vpop.permute.xlu1 %1476  ;;  %3253 = vmatprep.subr.mxu0 %v3571_v40 }
 0xbf3   :  { %3245 = vmatmul.mubr.msk.f32.vlgmr.msra.gmra.mxu1 %vm244_vm8, %v4073_v35  ;;  %3258 = vmatprep.subr.mxu1 %v3571_v40 }
 0xbf4   :  { %3259 = vmatpush3.msra.mxu1 %v3856_v29  ;;  %3254 = vmatpush3.msra.mxu0 %v3762_v52 }
 0xbf5   :  { %3260 = vmatprep.subr.mxu1 %v3571_v40  ;;  %3255 = vmatprep.mubr.msk.f32.mxu0 %vm3572_vm9, %v3571_v40 }
 0xbf6   :  { %3261 = vmatpush3.msra.mxu1 %v3863_v30  ;;  %3266 = vmatprep.mubr.msk.f32.mxu1 %vm3572_vm9, %v3571_v40 }
 0xbf7   :  { %3262 = vmatprep.subr.mxu1 %v3571_v40  ;;  %3269 = vmatprep.subr.mxu0 %v3571_v40 }
 0xbf8   :  { %3263 = vmatpush3.msra.mxu1 %v3869_v31 }
 0xbf9   :  { %3264 = vmatprep.subr.mxu1 %v3571_v40 }
 0xbfa   :  { %3265 = vmatpush3.msra.mxu1 %v3876_v32 }
 0xbfb   :  { %3280 = vmatprep.subr.mxu1 %v3571_v40 }
 0xcab   :  { %v1374_v61 = vpop.f32.mrf.mxu1  ;;  %v1471_v45 = vpop.f32.mrf.mxu0 }
 0xcac   :  { %v1385_v48 = vadd.f32 %v1374_v61, %v3812_v7  ;;  %v1378_v60 = vadd.f32 %v1374_v61, %v3806_v4  ;;  %v1472_v63 = vadd.f32 %v1471_v45, %v3925_v56 }
 0xcad   :  { %v3224_v50 = vpop.f32.mrf.mxu1  ;;  %v3235_v53 = vpop.f32.mrf.mxu0 }
 0xcae   :  { %1387 = vrot.lane.b32.xlu0 %v1385_v48, %s3573_s4  ;;  %v2841_v62 = vmul.f32 -1.442695, %v1378_v60 }
 0xcb0   :  { %3449 = vpow2.f32 %v2841_v62 }
 0xcb3   :  { %v1546_v54 = vpop.f32.mrf.mxu1 }
 0xcb4   :  { %v1557_v55 = vadd.f32 %v1546_v54, %v3889_v39  ;;  %v1550_v1 = vadd.f32 %v1546_v54, %v1472_v63 }
 0xcb5   :  { %v3246_v57 = vpop.f32.mrf.mxu1 }
 0xcb6   :  { %1559 = vrot.lane.b32.xlu1 %v1557_v55, %s3573_s4  ;;  %v2844_v3 = vmul.f32 -1.442695, %v1550_v1 }
 0xcb8   :  { %3451 = vpow2.f32 %v2844_v3 }
 0xcbd   :  { %v3450_v28 = vpop.eup %3449 }
 0xcbe   :  { %v1382_v5 = vadd.f32 1.0, %v3450_v28 }
 0xcc0   :  { %3453 = vrcp.f32 %v1382_v5 }
 0xcc5   :  { %v3452_v8 = vpop.eup %3451 }
 0xcc6   :  { %v1554_v10 = vadd.f32 1.0, %v3452_v8 }
 0xcc8   :  { %3455 = vrcp.f32 %v1554_v10 }
 0xccd   :  { %v3454_v11 = vpop.eup %3453 }
 0xcce   :  { %v1397_v20 = vsub.f32 1.0, %v3454_v11  ;;  %v1403_v22 = vmul.f32 %v3454_v11, %v4048_v34 }
 0xcd5   :  { %v3456_v13 = vpop.eup %3455 }
 0xcd6   :  { %v1575_v38 = vmul.f32 %v3456_v13, %v4053_v44 }
 0xd20   :  { %v1388_v12 = vpop.permute.xlu0 %1387 }
 0xd21   :  { %v1390_v58 = vmul.f32 %v3454_v11, %v1388_v12 }
 0xd23   :  { %1392 = vrot.lane.b32.xlu0 %v1390_v58, %s3573_s4 }
 0xd28   :  { %v1560_v14 = vpop.permute.xlu1 %1559 }
 0xd29   :  { %v1562_v59 = vmul.f32 %v3456_v13, %v1560_v14 }
 0xd2b   :  { %1564 = vrot.lane.b32.xlu1 %v1562_v59, %s3573_s4 }
 0xd95   :  { %v1393_v41 = vpop.permute.xlu0 %1392 }
 0xd96   :  { %v1395_v15 = vadd.f32 %v1393_v41, %v3806_v4  ;;  %v1569_v4 = vsub.f32 1.0, %v3456_v13 }
 0xd98   :  { %3457 = vtanh.f32 %v1395_v15 }
 0xd9d   :  { %v1565_v16 = vpop.permute.xlu1 %1564 }
 0xd9e   :  { %v1567_v17 = vadd.f32 %v1565_v16, %v1472_v63 }
 0xda0   :  { %3459 = vtanh.f32 %v1567_v17 }
 0xda5   :  { %v3458_v18 = vpop.eup %3457 }
 0xda6   :  { %1399 = vrot.lane.b32.xlu0 %v3458_v18, %s3574_s24 }
 0xdad   :  { %v3460_v19 = vpop.eup %3459 }
 0xdae   :  { %1571 = vrot.lane.b32.xlu1 %v3460_v19, %s3574_s24 }
 0xe18   :  { %v1400_v21 = vpop.permute.xlu0 %1399 }
 0xe19   :  { %v1402_v27 = vmul.f32 %v1400_v21, %v1397_v20 }
 0xe1b   :  { %v4105_v33 = vadd.f32 %v1403_v22, %v1402_v27 }
 0xe1d   :  { %1578 = vrot.lane.b32.xlu0 %v4105_v33, %s3574_s24 }
 0xe20   :  { %v1572_v0 = vpop.permute.xlu1 %1571 }
 0xe21   :  { %v1574_v42 = vmul.f32 %v1572_v0, %v1569_v4  ;;  %v3537_v0 = vld [vmem:[%s4364_s3 + $0x8] sm:$0xff] }
 0xe23   :  { %v4110_v43 = vadd.f32 %v1575_v38, %v1574_v42 }
 0xe25   :  { %1750 = vrot.lane.b32.xlu1 %v4110_v43, %s3574_s24 }
 0xe8f   :  { %v1579_v46 = vpop.permute.xlu0 %1578 }
 0xe90   :  { %3256 = vmatmul.mubr.msk.f32.vlgmr.msra.gmra.mxu0 %vm244_vm8, %v1579_v46  ;;  %3267 = vmatmul.mubr.msk.f32.vlgmr.msra.gmra.mxu1 %vm244_vm8, %v1579_v46 }
 0xe91   :  { %3270 = vmatpush3.msra.mxu0 %v3824_v23  ;;  %3277 = vmatprep.mubr.msk.f32.mxu0 %vm3572_vm9, %v3571_v40 }
 0xe92   :  { %3271 = vmatprep.subr.mxu0 %v3571_v40  ;;  %3281 = vmatpush3.msra.mxu1 %v3739_v47 }
 0xe93   :  { %3272 = vmatpush3.msra.mxu0 %v3829_v24  ;;  %3282 = vmatprep.subr.mxu1 %v3571_v40 }
 0xe94   :  { %3273 = vmatprep.subr.mxu0 %v3571_v40  ;;  %3283 = vmatpush3.msra.mxu1 %v3746_v49 }
 0xe95   :  { %3274 = vmatpush3.msra.mxu0 %v3836_v25  ;;  %3284 = vmatprep.subr.mxu1 %v3571_v40 }
 0xe96   :  { %3275 = vmatprep.subr.mxu0 %v3571_v40  ;;  %3285 = vmatpush3.msra.mxu1 %v3753_v51 }
 0xe97   :  { %3276 = vmatpush3.msra.mxu0 %v3843_v26  ;;  %v4130_v34 = vpop.permute.xlu1 %1750  ;;  %3286 = vmatprep.subr.mxu1 %v3571_v40 }
 0xe98   :  { %3278 = vmatmul.mubr.msk.f32.vlgmr.msra.gmra.mxu0 %vm244_vm8, %v4130_v34  ;;  %3291 = vmatprep.subr.mxu0 %v3571_v40 }
 0xe99   :  { %3292 = vmatpush3.msra.mxu0 %v3856_v29  ;;  %3287 = vmatpush3.msra.mxu1 %v3762_v52 }
 0xe9a   :  { %3293 = vmatprep.subr.mxu0 %v3571_v40  ;;  %3288 = vmatprep.mubr.msk.f32.mxu1 %vm3572_vm9, %v3571_v40 }
 0xe9b   :  { %3294 = vmatpush3.msra.mxu0 %v3863_v30  ;;  %3302 = vmatprep.subr.mxu1 %v3571_v40 }
 0xe9c   :  { %3295 = vmatprep.subr.mxu0 %v3571_v40  ;;  %3299 = vmatprep.mubr.msk.f32.mxu0 %vm3572_vm9, %v3571_v40 }
 0xe9d   :  { %3296 = vmatpush3.msra.mxu0 %v3869_v31 }
 0xe9e   :  { %3297 = vmatprep.subr.mxu0 %v3571_v40 }
 0xe9f   :  { %3298 = vmatpush3.msra.mxu0 %v3876_v32 }
 0xea0   :  { %3313 = vmatprep.subr.mxu0 %v3571_v40 }
 0xf50   :  { %v1648_v47 = vpop.f32.mrf.mxu0  ;;  %v1745_v49 = vpop.f32.mrf.mxu1 }
 0xf51   :  { %v1659_v51 = vadd.f32 %v1648_v47, %v3812_v7  ;;  %v1652_v50 = vadd.f32 %v1648_v47, %v3803_v2  ;;  %v1746_v54 = vadd.f32 %v1745_v49, %v3925_v56 }
 0xf52   :  { %v3257_v52 = vpop.f32.mrf.mxu0  ;;  %v3268_v44 = vpop.f32.mrf.mxu1 }
 0xf53   :  { %1661 = vrot.lane.b32.xlu0 %v1659_v51, %s3573_s4  ;;  %v2846_v53 = vmul.f32 -1.442695, %v1652_v50 }
 0xf55   :  { %3461 = vpow2.f32 %v2846_v53 }
 0xf58   :  { %v1820_v61 = vpop.f32.mrf.mxu0 }
 0xf59   :  { %v1831_v45 = vadd.f32 %v1820_v61, %v3889_v39  ;;  %v1824_v55 = vadd.f32 %v1820_v61, %v1746_v54 }
 0xf5a   :  { %v3279_v48 = vpop.f32.mrf.mxu0 }
 0xf5b   :  { %1833 = vrot.lane.b32.xlu1 %v1831_v45, %s3573_s4  ;;  %v2849_v57 = vmul.f32 -1.442695, %v1824_v55 }
 0xf5d   :  { %3463 = vpow2.f32 %v2849_v57 }
 0xf62   :  { %v3462_v60 = vpop.eup %3461 }
 0xf63   :  { %v1656_v62 = vadd.f32 1.0, %v3462_v60 }
 0xf65   :  { %3465 = vrcp.f32 %v1656_v62 }
 0xf6a   :  { %v3464_v63 = vpop.eup %3463 }
 0xf6b   :  { %v1828_v1 = vadd.f32 1.0, %v3464_v63 }
 0xf6d   :  { %3467 = vrcp.f32 %v1828_v1 }
 0xf72   :  { %v3466_v3 = vpop.eup %3465 }
 0xf73   :  { %v1671_v15 = vsub.f32 1.0, %v3466_v3  ;;  %v1677_v17 = vmul.f32 %v3466_v3, %v4105_v33  ;;  %v3535_v33 = vld [vmem:[%s4364_s3 + $0x18] sm:$0xff] }
 0xf7a   :  { %v3468_v8 = vpop.eup %3467 }
 0xf7b   :  { %v1849_v21 = vmul.f32 %v3468_v8, %v4110_v43 }
 0xfc5   :  { %v1662_v28 = vpop.permute.xlu0 %1661 }
 0xfc6   :  { %v1664_v5 = vmul.f32 %v3466_v3, %v1662_v28 }
 0xfc8   :  { %1666 = vrot.lane.b32.xlu0 %v1664_v5, %s3573_s4 }
 0xfcd   :  { %v1834_v10 = vpop.permute.xlu1 %1833 }
 0xfce   :  { %v1836_v11 = vmul.f32 %v3468_v8, %v1834_v10 }
 0xfd0   :  { %1838 = vrot.lane.b32.xlu1 %v1836_v11, %s3573_s4 }
0x103a   :  { %v1667_v12 = vpop.permute.xlu0 %1666 }
0x103b   :  { %v1669_v58 = vadd.f32 %v1667_v12, %v3803_v2  ;;  %v1843_v2 = vsub.f32 1.0, %v3468_v8 }
0x103d   :  { %3469 = vtanh.f32 %v1669_v58 }
0x1042   :  { %v1839_v13 = vpop.permute.xlu1 %1838 }
0x1043   :  { %v1841_v14 = vadd.f32 %v1839_v13, %v1746_v54 }
0x1045   :  { %3471 = vtanh.f32 %v1841_v14 }
0x104a   :  { %v3470_v59 = vpop.eup %3469 }
0x104b   :  { %1673 = vrot.lane.b32.xlu0 %v3470_v59, %s3574_s24 }
0x1052   :  { %v3472_v41 = vpop.eup %3471 }
0x1053   :  { %1845 = vrot.lane.b32.xlu1 %v3472_v41, %s3574_s24 }
0x10bd   :  { %v1674_v16 = vpop.permute.xlu0 %1673 }
0x10be   :  { %v1676_v18 = vmul.f32 %v1674_v16, %v1671_v15  ;;  %v3539_v16 = vld [vmem:[%s4367_s6 + $0x18] sm:$0xff] }
0x10c0   :  { %v4162_v19 = vadd.f32 %v1677_v17, %v1676_v18  ;;  %v3540_v17 = vld [vmem:[%s4366_s5 + $0x18] sm:$0xff]  ;;  %v3541_v18 = vld [vmem:[%s4367_s6 + $0x10] sm:$0xff] }
0x10c2   :  { %1852 = vrot.lane.b32.xlu0 %v4162_v19, %s3574_s24 }
0x10c5   :  { %v1846_v20 = vpop.permute.xlu1 %1845 }
0x10c6   :  { %v1848_v22 = vmul.f32 %v1846_v20, %v1843_v2  ;;  %v3543_v2 = vld [vmem:[%s4367_s6 + $0x8] sm:$0xff] }
0x10c7   :  { %v3544_v20 = vld [vmem:[%s4366_s5 + $0x8] sm:$0xff] }
0x10c8   :  { %v4167_v27 = vadd.f32 %v1849_v21, %v1848_v22  ;;  %v3545_v21 = vld [vmem:[%s4367_s6] sm:$0xff] }
0x10ca   :  { %2024 = vrot.lane.b32.xlu1 %v4167_v27, %s3574_s24 }
0x1134   :  { %v1853_v4 = vpop.permute.xlu0 %1852 }
0x1135   :  { %3289 = vmatmul.mubr.msk.f32.vlgmr.msra.gmra.mxu1 %vm244_vm8, %v1853_v4  ;;  %3300 = vmatmul.mubr.msk.f32.vlgmr.msra.gmra.mxu0 %vm244_vm8, %v1853_v4 }
0x1136   :  { %3303 = vmatpush3.msra.mxu1 %v3824_v23  ;;  %3310 = vmatprep.mubr.msk.f32.mxu1 %vm3572_vm9, %v3571_v40  ;;  %v3536_v23 = vld [vmem:[%s4364_s3 + $0x10] sm:$0xff] }
0x1137   :  { %3304 = vmatprep.subr.mxu1 %v3571_v40  ;;  %3314 = vmatpush3.msra.mxu0 %v3535_v33 }
0x1138   :  { %3305 = vmatpush3.msra.mxu1 %v3829_v24  ;;  %3315 = vmatprep.subr.mxu0 %v3571_v40 }
0x1139   :  { %3306 = vmatprep.subr.mxu1 %v3571_v40  ;;  %3316 = vmatpush3.msra.mxu0 %v3536_v23 }
0x113a   :  { %3307 = vmatpush3.msra.mxu1 %v3836_v25  ;;  %3317 = vmatprep.subr.mxu0 %v3571_v40  ;;  %v3538_v25 = vld [vmem:[%s4364_s3] sm:$0xff] }
0x113b   :  { %3308 = vmatprep.subr.mxu1 %v3571_v40  ;;  %3318 = vmatpush3.msra.mxu0 %v3537_v0 }
0x113c   :  { %3309 = vmatpush3.msra.mxu1 %v3843_v26  ;;  %v4193_v24 = vpop.permute.xlu1 %2024  ;;  %3319 = vmatprep.subr.mxu0 %v3571_v40 }
0x113d   :  { %3311 = vmatmul.mubr.msk.f32.vlgmr.msra.gmra.mxu1 %vm244_vm8, %v4193_v24  ;;  %3324 = vmatprep.subr.mxu1 %v3571_v40 }
0x113e   :  { %3325 = vmatpush3.msra.mxu1 %v3856_v29  ;;  %3320 = vmatpush3.msra.mxu0 %v3538_v25 }
0x113f   :  { %3326 = vmatprep.subr.mxu1 %v3571_v40  ;;  %3321 = vmatprep.mubr.msk.f32.mxu0 %vm3572_vm9, %v3571_v40 }
0x1140   :  { %3327 = vmatpush3.msra.mxu1 %v3863_v30  ;;  %3332 = vmatprep.mubr.msk.f32.mxu1 %vm3572_vm9, %v3571_v40 }
0x1141   :  { %3328 = vmatprep.subr.mxu1 %v3571_v40  ;;  %3335 = vmatprep.subr.mxu0 %v3571_v40 }
0x1142   :  { %3329 = vmatpush3.msra.mxu1 %v3869_v31 }
0x1143   :  { %3330 = vmatprep.subr.mxu1 %v3571_v40 }
0x1144   :  { %3331 = vmatpush3.msra.mxu1 %v3876_v32 }
0x1145   :  { %3346 = vmatprep.subr.mxu1 %v3571_v40 }
0x11f5   :  { %v1922_v26 = vpop.f32.mrf.mxu1  ;;  %v2019_v29 = vpop.f32.mrf.mxu0 }
0x11f6   :  { %v1933_v38 = vadd.f32 %v1922_v26, %v3812_v7  ;;  %v1926_v31 = vadd.f32 %v1922_v26, %v3815_v9  ;;  %v2020_v32 = vadd.f32 %v2019_v29, %v3925_v56 }
0x11f7   :  { %v3290_v30 = vpop.f32.mrf.mxu1  ;;  %v3301_v42 = vpop.f32.mrf.mxu0 }
0x11f8   :  { %1935 = vrot.lane.b32.xlu0 %v1933_v38, %s3573_s4  ;;  %v2851_v49 = vmul.f32 -1.442695, %v1926_v31 }
0x11fa   :  { %3473 = vpow2.f32 %v2851_v49 }
0x11fd   :  { %v2094_v43 = vpop.f32.mrf.mxu1 }
0x11fe   :  { %v2105_v46 = vadd.f32 %v2094_v43, %v3889_v39  ;;  %v2098_v51 = vadd.f32 %v2094_v43, %v2020_v32 }
0x11ff   :  { %v3312_v47 = vpop.f32.mrf.mxu1 }
0x1200   :  { %2107 = vrot.lane.b32.xlu1 %v2105_v46, %s3573_s4  ;;  %v2854_v52 = vmul.f32 -1.442695, %v2098_v51 }
0x1202   :  { %3475 = vpow2.f32 %v2854_v52 }
0x1207   :  { %v3474_v44 = vpop.eup %3473 }
0x1208   :  { %v1930_v61 = vadd.f32 1.0, %v3474_v44 }
0x120a   :  { %3477 = vrcp.f32 %v1930_v61 }
0x120f   :  { %v3476_v45 = vpop.eup %3475 }
0x1210   :  { %v2102_v48 = vadd.f32 1.0, %v3476_v45 }
0x1212   :  { %3479 = vrcp.f32 %v2102_v48 }
0x1217   :  { %v3478_v50 = vpop.eup %3477 }
0x1218   :  { %v1945_v8 = vsub.f32 1.0, %v3478_v50  ;;  %v1951_v11 = vmul.f32 %v3478_v50, %v4162_v19  ;;  %v3542_v19 = vld [vmem:[%s4366_s5 + $0x10] sm:$0xff] }
0x121f   :  { %v3480_v55 = vpop.eup %3479 }
0x1220   :  { %v2123_v14 = vmul.f32 %v3480_v55, %v4167_v27  ;;  %v3546_v27 = vld [vmem:[%s4366_s5] sm:$0xff] }
0x126a   :  { %v1936_v53 = vpop.permute.xlu0 %1935 }
0x126b   :  { %v1938_v54 = vmul.f32 %v3478_v50, %v1936_v53 }
0x126d   :  { %1940 = vrot.lane.b32.xlu0 %v1938_v54, %s3573_s4 }
0x1272   :  { %v2108_v57 = vpop.permute.xlu1 %2107 }
0x1273   :  { %v2110_v60 = vmul.f32 %v3480_v55, %v2108_v57  ;;  %v2579_v57 = vld [vmem:[%s4369_s8 + $0x18] sm:$0xff] }
0x1275   :  { %2112 = vrot.lane.b32.xlu1 %v2110_v60, %s3573_s4 }
0x12df   :  { %v1941_v62 = vpop.permute.xlu0 %1940 }
0x12e0   :  { %v1943_v63 = vadd.f32 %v1941_v62, %v3815_v9  ;;  %v2117_v9 = vsub.f32 1.0, %v3480_v55 }
0x12e2   :  { %3481 = vtanh.f32 %v1943_v63 }
0x12e7   :  { %v2113_v1 = vpop.permute.xlu1 %2112 }
0x12e8   :  { %v2115_v3 = vadd.f32 %v2113_v1, %v2020_v32 }
0x12ea   :  { %3483 = vtanh.f32 %v2115_v3 }
0x12ef   :  { %v3482_v28 = vpop.eup %3481 }
0x12f0   :  { %1947 = vrot.lane.b32.xlu0 %v3482_v28, %s3574_s24 }
0x12f7   :  { %v3484_v5 = vpop.eup %3483 }
0x12f8   :  { %2119 = vrot.lane.b32.xlu1 %v3484_v5, %s3574_s24 }
0x1362   :  { %v1948_v10 = vpop.permute.xlu0 %1947 }
0x1363   :  { %v1950_v12 = vmul.f32 %v1948_v10, %v1945_v8 }
0x1365   :  { %v4227_v58 = vadd.f32 %v1951_v11, %v1950_v12 }
0x1367   :  { %2126 = vrot.lane.b32.xlu0 %v4227_v58, %s3574_s24 }
0x136a   :  { %v2120_v13 = vpop.permute.xlu1 %2119 }
0x136b   :  { %v2122_v59 = vmul.f32 %v2120_v13, %v2117_v9  ;;  %v2578_v9 = vld [vmem:[%s4369_s8 + $0x10] sm:$0xff]  ;;  %v2576_v13 = vld [vmem:[%s4369_s8] sm:$0xff] }
0x136d   :  { %v4232_v41 = vadd.f32 %v2123_v14, %v2122_v59 }
0x136f   :  { %2298 = vrot.lane.b32.xlu1 %v4232_v41, %s3574_s24 }
0x13d9   :  { %v2127_v15 = vpop.permute.xlu0 %2126 }
0x13da   :  { %3322 = vmatmul.mubr.msk.f32.vlgmr.msra.gmra.mxu0 %vm244_vm8, %v2127_v15  ;;  %3333 = vmatmul.mubr.msk.f32.vlgmr.msra.gmra.mxu1 %vm244_vm8, %v2127_v15 }
0x13db   :  { %3336 = vmatpush3.msra.mxu0 %v3539_v16  ;;  %3343 = vmatprep.mubr.msk.f32.mxu0 %vm3572_vm9, %v3571_v40 }
0x13dc   :  { %3337 = vmatprep.subr.mxu0 %v3571_v40  ;;  %3347 = vmatpush3.msra.mxu1 %v3540_v17 }
0x13dd   :  { %3338 = vmatpush3.msra.mxu0 %v3541_v18  ;;  %3348 = vmatprep.subr.mxu1 %v3571_v40 }
0x13de   :  { %3339 = vmatprep.subr.mxu0 %v3571_v40  ;;  %3349 = vmatpush3.msra.mxu1 %v3542_v19 }
0x13df   :  { %3340 = vmatpush3.msra.mxu0 %v3543_v2  ;;  %3350 = vmatprep.subr.mxu1 %v3571_v40 }
0x13e0   :  { %3341 = vmatprep.subr.mxu0 %v3571_v40  ;;  %3351 = vmatpush3.msra.mxu1 %v3544_v20 }
0x13e1   :  { %3342 = vmatpush3.msra.mxu0 %v3545_v21  ;;  %v4266_v22 = vpop.permute.xlu1 %2298  ;;  %3352 = vmatprep.subr.mxu1 %v3571_v40 }
0x13e2   :  { %3344 = vmatmul.mubr.msk.f32.vlgmr.msra.gmra.mxu0 %vm244_vm8, %v4266_v22  ;;  %3353 = vmatpush3.msra.mxu1 %v3546_v27 }
0x13e3   :  { %3354 = vmatprep.mubr.msk.f32.mxu1 %vm3572_vm9, %v3571_v40  ;;  %3357 = vmatprep.subr.mxu0 %v3571_v40 }
0x13e4   :  { %3358 = vmatpush3.msra.mxu0 %v3539_v16  ;;  %3365 = vmatprep.mubr.msk.f32.mxu0 %vm3572_vm9, %v3571_v40 }
0x13e5   :  { %3359 = vmatprep.subr.mxu0 %v3571_v40  ;;  %3368 = vmatprep.subr.mxu1 %v2579_v57 }
0x13e6   :  { %3360 = vmatpush3.msra.mxu0 %v3541_v18 }
0x13e7   :  { %3361 = vmatprep.subr.mxu0 %v3571_v40 }
0x13e8   :  { %3362 = vmatpush3.msra.mxu0 %v3543_v2 }
0x13e9   :  { %3363 = vmatprep.subr.mxu0 %v3571_v40 }
0x13ea   :  { %3364 = vmatpush3.msra.mxu0 %v3545_v21 }
0x149a   :  { %v2196_v4 = vpop.f32.mrf.mxu0  ;;  %v2293_v33 = vpop.f32.mrf.mxu1 }
0x149b   :  { %v2207_v23 = vadd.f32 %v2196_v4, %v3812_v7  ;;  %v2200_v30 = vadd.f32 %v2196_v4, %v3809_v6  ;;  %v2294_v40 = vadd.f32 %v2293_v33, %v3925_v56  ;;  %v2863_v4 = vld [vmem:[%s4370_s9] ss:$0 sm:$0xff]  ;;  %s3575_s9 = smov [#allocation2]  }
0x149c   :  { %v3323_v0 = vpop.f32.mrf.mxu0  ;;  %v3334_v25 = vpop.f32.mrf.mxu1 }
0x149d   :  { %2209 = vrot.lane.b32.xlu1 %v2207_v23, %s3573_s4  ;;  %v2856_v42 = vmul.f32 -1.442695, %v2200_v30 }
0x149f   :  { %3485 = vpow2.f32 %v2856_v42 }
0x14a2   :  { %v2368_v26 = vpop.f32.mrf.mxu0 }
0x14a3   :  { %v2379_v29 = vadd.f32 %v2368_v26, %v3889_v39  ;;  %v2372_v43 = vadd.f32 %v2368_v26, %v2294_v40 }
0x14a4   :  { %v3345_v38 = vpop.f32.mrf.mxu0 }
0x14a5   :  { %2381 = vrot.lane.b32.xlu0 %v2379_v29, %s3573_s4  ;;  %v2859_v46 = vmul.f32 -1.442695, %v2372_v43 }
0x14a7   :  { %3487 = vpow2.f32 %v2859_v46 }
0x14ac   :  { %v3486_v7 = vpop.eup %3485 }
0x14ad   :  { %v2204_v47 = vadd.f32 1.0, %v3486_v7 }
0x14af   :  { %3489 = vrcp.f32 %v2204_v47 }
0x14b4   :  { %v3488_v31 = vpop.eup %3487 }
0x14b5   :  { %v2376_v49 = vadd.f32 1.0, %v3488_v31 }
0x14b7   :  { %3491 = vrcp.f32 %v2376_v49 }
0x14bc   :  { %v3490_v32 = vpop.eup %3489 }
0x14bd   :  { %v2219_v62 = vsub.f32 1.0, %v3490_v32  ;;  %v2225_v1 = vmul.f32 %v3490_v32, %v4227_v58  ;;  %v2577_v58 = vld [vmem:[%s4369_s8 + $0x8] sm:$0xff] }
0x14c4   :  { %v3492_v44 = vpop.eup %3491 }
0x14c5   :  { %v2391_v28 = vsub.f32 1.0, %v3492_v44  ;;  %v2397_v8 = vmul.f32 %v3492_v44, %v4232_v41 }
0x150f   :  { %v2210_v51 = vpop.permute.xlu1 %2209 }
0x1510   :  { %v2212_v52 = vmul.f32 %v3490_v32, %v2210_v51 }
0x1512   :  { %2214 = vrot.lane.b32.xlu1 %v2212_v52, %s3573_s4 }
0x1517   :  { %v2382_v61 = vpop.permute.xlu0 %2381 }
0x1518   :  { %v2384_v45 = vmul.f32 %v3492_v44, %v2382_v61 }
0x151a   :  { %2386 = vrot.lane.b32.xlu0 %v2384_v45, %s3573_s4 }
0x1584   :  { %v2215_v48 = vpop.permute.xlu1 %2214 }
0x1585   :  { %v2217_v50 = vadd.f32 %v2215_v48, %v3809_v6 }
0x1587   :  { %3493 = vtanh.f32 %v2217_v50 }
0x158c   :  { %v2387_v53 = vpop.permute.xlu0 %2386 }
0x158d   :  { %v2389_v54 = vadd.f32 %v2387_v53, %v2294_v40 }
0x158f   :  { %3495 = vtanh.f32 %v2389_v54 }
0x1594   :  { %v3494_v55 = vpop.eup %3493 }
0x1595   :  { %2221 = vrot.lane.b32.xlu1 %v3494_v55, %s3574_s24 }
0x159c   :  { %v3496_v60 = vpop.eup %3495 }
0x159d   :  { %2393 = vrot.lane.b32.xlu0 %v3496_v60, %s3574_s24 }
0x1607   :  { %v2222_v63 = vpop.permute.xlu1 %2221 }
0x1608   :  { %v2224_v6 = vmul.f32 %v2222_v63, %v2219_v62 }
0x160a   :  { %v2226_v3 = vadd.f32 %v2225_v1, %v2224_v6 }
0x160c   :  { %2400 = vrot.lane.b32.xlu1 %v2226_v3, %s3574_s24 }
0x160f   :  { %v2394_v5 = vpop.permute.xlu0 %2393 }
0x1610   :  { %v2396_v10 = vmul.f32 %v2394_v5, %v2391_v28 }
0x1612   :  { %v2398_v11 = vadd.f32 %v2397_v8, %v2396_v10 }
0x1614   :  { %2475 = vrot.lane.b32.xlu0 %v2398_v11, %s3574_s24 }
0x167e   :  { %v2401_v12 = vpop.permute.xlu1 %2400 }
0x167f   :  { %3355 = vmatmul.mubr.msk.f32.vlgmr.msra.gmra.mxu1 %vm244_vm8, %v2401_v12 }
0x1680   :  { %3369 = vmatpush3.msra.mxu1 %v2579_v57  ;;  %3376 = vmatprep.mubr.msk.f32.mxu1 %vm244_vm8, %v3958_v37 }
0x1681   :  { %3370 = vmatprep.subr.mxu1 %v2578_v9 }
0x1682   :  { %3371 = vmatpush3.msra.mxu1 %v2578_v9 }
0x1683   :  { %3372 = vmatprep.subr.mxu1 %v2577_v58 }
0x1684   :  { %3373 = vmatpush3.msra.mxu1 %v2577_v58 }
0x1685   :  { %3374 = vmatprep.subr.mxu1 %v2576_v13 }
0x1686   :  { %3375 = vmatpush3.msra.mxu1 %v2576_v13  ;;  %v2476_v14 = vpop.permute.xlu0 %2475 }
0x1687   :  { %3366 = vmatmul.mubr.msk.f32.vlgmr.msra.gmra.mxu0 %vm244_vm8, %v2476_v14  ;;  %3377 = vmatmul.mubr.msk.f32.vlgmr.msra.gmra.mxu1 %vm244_vm8, %v4016_v36 }
0x1688   :  { %3379 = vmatprep.mubr.msk.f32.mxu1 %vm244_vm8, %v4073_v35 }
0x168b   :  { %3380 = vmatmul.mubr.msk.f32.gmra.mxu1 %vm244_vm8, %v4130_v34 }
0x168c   :  { %3382 = vmatprep.mubr.msk.f32.mxu1 %vm244_vm8, %v4193_v24 }
0x168f   :  { %3383 = vmatmul.mubr.msk.f32.gmra.mxu1 %vm244_vm8, %v4266_v22 }
0x1690   :  { %3385 = vmatprep.mubr.msk.f32.mxu1 %vm244_vm8, %v2476_v14 }
0x173f   :  { %v2470_v37 = vpop.f32.mrf.mxu1 }
0x1740   :  { %v2471_v35 = vadd.f32 %v2470_v37, %v3925_v56 }
0x1741   :  { %v3356_v59 = vpop.f32.mrf.mxu1 }
0x1747   :  { %v2545_v41 = vpop.f32.mrf.mxu0  ;;  %v3378_v22 = vpop.f32.mrf.mxu1 }
0x1748   :  { %v2556_v15 = vadd.f32 %v2545_v41, %v3889_v39  ;;  %v2549_v16 = vadd.f32 %v2545_v41, %v2471_v35  ;;  %v2664_v46 = vadd.f32 %v3378_v22, %v2863_v4 }
0x1749   :  { %v3367_v36 = vpop.f32.mrf.mxu0  ;;  %v2658_v27 = vpop.f32.mrf.mxu1 }
0x174a   :  { %2558 = vrot.lane.b32.xlu0 %v2556_v15, %s3573_s4  ;;  %v2862_v34 = vmul.f32 -1.442695, %v2549_v16  ;;  %v2659_v33 = vadd.f32 %v2863_v4, %v2658_v27 }
0x174b   :  { %v3381_v56 = vpop.f32.mrf.mxu1 }
0x174c   :  { %3497 = vpow2.f32 %v2862_v34  ;;  %v2674_v25 = vadd.f32 %v3381_v56, %v2863_v4 }
0x174d   :  { %v2668_v23 = vpop.f32.mrf.mxu1 }
0x174e   :  { %v2669_v0 = vadd.f32 %v2863_v4, %v2668_v23 }
0x174f   :  { %v3384_v26 = vpop.f32.mrf.mxu1 }
0x1750   :  { %v2684_v29 = vadd.f32 %v3384_v26, %v2863_v4 }
0x1751   :  { %v2678_v7 = vpop.f32.mrf.mxu1 }
0x1752   :  { %v2679_v47 = vadd.f32 %v2863_v4, %v2678_v7 }
0x1759   :  { %v3498_v17 = vpop.eup %3497 }
0x175a   :  { %v2553_v24 = vadd.f32 1.0, %v3498_v17 }
0x175c   :  { %3499 = vrcp.f32 %v2553_v24 }
0x1769   :  { %v3500_v18 = vpop.eup %3499 }
0x176a   :  { %v2568_v38 = vsub.f32 1.0, %v3500_v18  ;;  %v2574_v42 = vmul.f32 %v3500_v18, %v2398_v11 }
0x17bc   :  { %v2559_v19 = vpop.permute.xlu0 %2558 }
0x17bd   :  { %v2561_v2 = vmul.f32 %v3500_v18, %v2559_v19 }
0x17bf   :  { %2563 = vrot.lane.b32.xlu1 %v2561_v2, %s3573_s4  ;;  %s2790_s4 = sshll.u32 %s3575_s9, 4  ;;  %s2791_s4 = int_to_ptr.vmem [resolvable:$true] %s2790_s4 }
0x17c0   :  { %p3552_p1 = scmp.lt.s32.totalorder %s2791_s4, %s2791_s4 }
0x1831   :  { %v2564_v20 = vpop.permute.xlu1 %2563 }
0x1832   :  { %v2566_v21 = vadd.f32 %v2564_v20, %v2471_v35 }
0x1834   :  { %3501 = vtanh.f32 %v2566_v21 }
0x1841   :  { %v3502_v39 = vpop.eup %3501 }
0x1842   :  { %2570 = vrot.lane.b32.xlu0 %v3502_v39, %s3574_s24 }
0x1861   :  { %2697 = vmax.xlane.f32.xlu0 %v2659_v33 }
0x1865   :  { %2701 = vmax.xlane.f32.xlu0 %v2669_v0 }
0x1869   :  { %2703 = vmax.xlane.f32.xlu0 %v2674_v25 }
0x186d   :  { %2707 = vmax.xlane.f32.xlu0 %v2684_v29 }
0x18b4   :  { %v2571_v30 = vpop.permute.xlu0 %2570 }
0x18b5   :  { %v2573_v40 = vmul.f32 %v2571_v30, %v2568_v38 }
0x18b7   :  { %v2575_v43 = vadd.f32 %v2574_v42, %v2573_v40 }
0x18b9   :  { %2588 = vrot.lane.b32.xlu1 %v2575_v43, %s3574_s24  ;;  %s3547_s24 = scalar_lea.vmem %s2791_s4, 1024 }
0x18ba   :  { %p3548_p0 = scmp.ne.s32.totalorder %s2791_s4, %s3547_s24  ;;  %p3553_p2 = scmp.lt.s32.totalorder %s3547_s24, %s3547_s24 }
0x18bc   :  { %p3554_p3 = por %p3553_p2, %p3552_p1 }
0x18be   :  { %p3555_p4 = pnand %p3554_p3, %p3548_p0 }
0x18dd   :  { %2699 = vmax.xlane.f32.xlu1 %v2664_v46 }
0x18e1   :  { %2705 = vmax.xlane.f32.xlu1 %v2679_v47 }
0x18ea   :  { %v2698_v49 = vpop.xlane.xlu0 %2697 }
0x18eb   :  { %v4336_v61 = vsub.f32 %v2659_v33, %v2698_v49 }
0x18ed   :  { %v2721_v53 = vmul.f32 1.442695, %v4336_v61 }
0x18ee   :  { %v2702_v32 = vpop.xlane.xlu0 %2701 }
0x18ef   :  { %v4342_v54 = vsub.f32 %v2669_v0, %v2702_v32 }
0x18f1   :  { %v2725_v62 = vmul.f32 1.442695, %v4342_v54 }
0x18f2   :  { %v2704_v52 = vpop.xlane.xlu0 %2703 }
0x18f3   :  { %v4338_v45 = vsub.f32 %v2674_v25, %v2704_v52 }
0x18f5   :  { %v2727_v57 = vmul.f32 1.442695, %v4338_v45 }
0x18f6   :  { %v2708_v50 = vpop.xlane.xlu0 %2707 }
0x18f7   :  { %v4345_v60 = vsub.f32 %v2684_v29, %v2708_v50 }
0x18f9   :  { %v2731_v1 = vmul.f32 1.442695, %v4345_v60 }
0x192b   :  { %v2589_v31 = vpop.permute.xlu1 %2588 }
0x192c   :  { %3386 = vmatmul.mubr.msk.f32.gmra.mxu1 %vm244_vm8, %v2589_v31 }
0x1966   :  { %v2700_v51 = vpop.xlane.xlu1 %2699 }
0x1967   :  { %v4334_v44 = vsub.f32 %v2664_v46, %v2700_v51 }
0x1969   :  { %v2723_v48 = vmul.f32 1.442695, %v4334_v44 }
0x196a   :  { %v2706_v55 = vpop.xlane.xlu1 %2705 }
0x196b   :  { %3503 = vpow2.f32 %v2723_v48  ;;  %v4348_v63 = vsub.f32 %v2679_v47, %v2706_v55 }
0x196c   :  { %3505 = vpow2.f32 %v2721_v53 }
0x196d   :  { %3507 = vpow2.f32 %v2727_v57  ;;  %v2729_v6 = vmul.f32 1.442695, %v4348_v63 }
0x196e   :  { %3509 = vpow2.f32 %v2725_v62 }
0x196f   :  { %3511 = vpow2.f32 %v2731_v1 }
0x1970   :  { %3513 = vpow2.f32 %v2729_v6 }
0x1978   :  { %v3504_v10 = vpop.eup %3503 }
0x1979   :  { %v3506_v11 = vpop.eup %3505 }
0x197a   :  { %v3508_v12 = vpop.eup %3507 }
0x197b   :  { %v3510_v9 = vpop.eup %3509 }
0x197c   :  { %v3512_v58 = vpop.eup %3511 }
0x197d   :  { %v3514_v13 = vpop.eup %3513 }
0x19ec   :  { %v3387_v3 = vpop.f32.mrf.mxu1 }
0x19ed   :  { %v2694_v28 = vadd.f32 %v3387_v3, %v2863_v4 }
0x19ee   :  { %v2688_v5 = vpop.f32.mrf.mxu1 }
0x19ef   :  { %v2689_v8 = vadd.f32 %v2863_v4, %v2688_v5  ;;  %2711 = vmax.xlane.f32.xlu0 %v2694_v28 }
0x19f1   :  { %2709 = vmax.xlane.f32.xlu1 %v2689_v8 }
0x19f3   :  { %2739 = vadd.xlane.f32.xlu0 %v3504_v10 }
0x19f5   :  { %2737 = vadd.xlane.f32.xlu1 %v3506_v11 }
0x19f7   :  { %2743 = vadd.xlane.f32.xlu0 %v3508_v12 }
0x19f9   :  { %2741 = vadd.xlane.f32.xlu1 %v3510_v9 }
0x19fb   :  { %2747 = vadd.xlane.f32.xlu0 %v3512_v58 }
0x19fd   :  { %2745 = vadd.xlane.f32.xlu1 %v3514_v13 }
0x1a78   :  { %v2712_v14 = vpop.xlane.xlu0 %2711 }
0x1a79   :  { %v2720_v37 = vsub.f32 %v2694_v28, %v2712_v14 }
0x1a7a   :  { %v2710_v59 = vpop.xlane.xlu1 %2709 }
0x1a7b   :  { %v2735_v41 = vmul.f32 1.442695, %v2720_v37  ;;  %v2719_v15 = vsub.f32 %v2689_v8, %v2710_v59 }
0x1a7c   :  { %v2740_v36 = vpop.xlane.xlu0 %2739 }
0x1a7d   :  { %3515 = vpow2.f32 %v2735_v41  ;;  %v2733_v35 = vmul.f32 1.442695, %v2719_v15 }
0x1a7e   :  { %3517 = vlog2.f32 %v2740_v36  ;;  %v2738_v16 = vpop.xlane.xlu1 %2737 }
0x1a7f   :  { %3519 = vpow2.f32 %v2733_v35 }
0x1a80   :  { %3521 = vlog2.f32 %v2738_v16  ;;  %v2744_v34 = vpop.xlane.xlu0 %2743 }
0x1a81   :  { %3523 = vlog2.f32 %v2744_v34 }
0x1a82   :  { %v2742_v17 = vpop.xlane.xlu1 %2741 }
0x1a83   :  { %3525 = vlog2.f32 %v2742_v17 }
0x1a84   :  { %v2748_v24 = vpop.xlane.xlu0 %2747 }
0x1a85   :  { %3527 = vlog2.f32 %v2748_v24 }
0x1a86   :  { %v2746_v18 = vpop.xlane.xlu1 %2745 }
0x1a87   :  { %3529 = vlog2.f32 %v2746_v18 }
0x1a8a   :  { %v3516_v19 = vpop.eup %3515 }
0x1a8b   :  { %v3518_v2 = vpop.eup %3517  ;;  %2751 = vadd.xlane.f32.xlu0 %v3516_v19 }
0x1a8c   :  { %v3520_v20 = vpop.eup %3519  ;;  %v2756_v21 = vmul.f32 0.6931472, %v3518_v2 }
0x1a8d   :  { %v3522_v39 = vpop.eup %3521  ;;  %2749 = vadd.xlane.f32.xlu1 %v3520_v20 }
0x1a8e   :  { %v3524_v22 = vpop.eup %3523  ;;  %v2770_v27 = vsub.f32 %v4334_v44, %v2756_v21  ;;  %v2754_v56 = vmul.f32 0.6931472, %v3522_v39 }
0x1a8f   :  { %v2760_v4 = vmul.f32 0.6931472, %v3524_v22 }
0x1a90   :  { %v3526_v33 = vpop.eup %3525  ;;  %2778 = vst [vmem:[#allocation2 + $0x8] sm:$0xff] %v2770_v27  ;;  %v2769_v23 = vsub.f32 %v4336_v61, %v2754_v56 }
0x1a91   :  { %v2772_v0 = vsub.f32 %v4338_v45, %v2760_v4  ;;  %v2758_v25 = vmul.f32 0.6931472, %v3526_v33 }
0x1a92   :  { %v3528_v26 = vpop.eup %3527  ;;  %2777 = vst [vmem:[#allocation2] sm:$0xff] %v2769_v23 }
0x1a93   :  { %2780 = vst [vmem:[#allocation2 + $0x18] sm:$0xff] %v2772_v0  ;;  %v2771_v29 = vsub.f32 %v4342_v54, %v2758_v25  ;;  %v2764_v38 = vmul.f32 0.6931472, %v3528_v26 }
0x1a94   :  { %v3530_v30 = vpop.eup %3529 }
0x1a95   :  { %2779 = vst [vmem:[#allocation2 + $0x10] sm:$0xff] %v2771_v29  ;;  %v2774_v42 = vsub.f32 %v4345_v60, %v2764_v38  ;;  %v2762_v40 = vmul.f32 0.6931472, %v3530_v30 }
0x1a97   :  { %2782 = vst [vmem:[#allocation2 + $0x28] sm:$0xff] %v2774_v42  ;;  %v2773_v43 = vsub.f32 %v4348_v63, %v2762_v40 }
0x1a99   :  { %2781 = vst [vmem:[#allocation2 + $0x20] sm:$0xff] %v2773_v43 }
0x1b14   :  { %v2752_v46 = vpop.xlane.xlu0 %2751 }
0x1b15   :  { %3531 = vlog2.f32 %v2752_v46 }
0x1b16   :  { %v2750_v7 = vpop.xlane.xlu1 %2749 }
0x1b17   :  { %3533 = vlog2.f32 %v2750_v7 }
0x1b22   :  { %v3532_v47 = vpop.eup %3531 }
0x1b23   :  { %v2768_v31 = vmul.f32 0.6931472, %v3532_v47 }
0x1b24   :  { %v3534_v49 = vpop.eup %3533 }
0x1b25   :  { %v2776_v32 = vsub.f32 %v2720_v37, %v2768_v31  ;;  %v2766_v51 = vmul.f32 0.6931472, %v3534_v49 }
0x1b27   :  { %2784 = vst [vmem:[#allocation2 + $0x38] sm:$0xff] %v2776_v32  ;;  %v2775_v52 = vsub.f32 %v2719_v15, %v2766_v51 }
0x1b29   :  { %2783 = vst [vmem:[#allocation2 + $0x30] sm:$0xff] %v2775_v52 }
0x1b2a   :  { %3558 = shalt.err (!%p3555_p4)
}
0x1b2b   :  { %s3576_s21 = smov 128   ;;  %s3577_s3 = smov 8  }
0x1b2c   :  { %2796 = dma.vmem_to_hbm [thread:$0]  %s2791_s4, 1024, %s4371_s10, [#allocation3], %s3576_s21, %s3576_s21, %s3577_s3  }
0x1b2d   :  { %3567 = dma.done.wait [#allocation3], 1024  }
0x1b2e   :  { %3568 = vsyncadd [#allocation3], 4294966272 }
0x1b2f   :  { %2800 = vsyncpa [#allocation3], 1 }

</bundles_post_ra>
